<compile_context>
chip_gen: v7x
topology: tpu7x:2x2x1
jax: 0.10.0
libtpu: 0.0.40
codegen_flags: <defaults>
</compile_context>

<pallas_src>
import functools

import jax
import jax.numpy as jnp
from jax.experimental import pallas as pl
from jax.experimental.pallas import tpu as pltpu

NEG_BIG = jnp.float32(-1e30)          # finite "−inf" to avoid NaN on fully-masked rows
VMEM_LIMIT = 32 * 1024 * 1024         # safe on v5e/v6e (128 MiB) and v7x (64 MiB physical)


# ----------------------------------------------------------------------------
# Fused multi-head attention + residual + LayerNorm kernel.  grid = (B,).
# One batch element per grid step; all heads handled inside the kernel.
# ----------------------------------------------------------------------------
def _mha_ln_kernel(xq_ref, xkv_ref, amask_ref, kpad_ref,
                   wq_ref, wk_ref, wv_ref, wo_ref,
                   bq_ref, bk_ref, bv_ref, bo_ref,
                   g_ref, beta_ref, out_ref, *, num_heads, eps):
    bf16 = jnp.bfloat16
    dk = wo_ref.shape[1]

    xq = xq_ref[0]                       # (T, D) f32 (residual path stays f32)
    xkv = xkv_ref[0]                     # (S, D) f32
    xq_b = xq.astype(bf16)
    xkv_b = xkv.astype(bf16)

    def proj(xb, w_ref, b_ref):
        # xb (L, D) bf16  @  W (Dout, Din) bf16  (contract Din)  -> (L, Dout) f32
        y = jax.lax.dot_general(xb, w_ref[...], (((1,), (1,)), ((), ())),
                                preferred_element_type=jnp.float32)
        return y + b_ref[...]

    q = proj(xq_b, wq_ref, bq_ref)       # (T, D) f32; scale pre-folded into wq/bq
    k = proj(xkv_b, wk_ref, bk_ref)      # (S, D) f32
    v = proj(xkv_b, wv_ref, bv_ref)      # (S, D) f32

    bias = amask_ref[...] + kpad_ref[0]  # (T, S) + (1, S) -> (T, S) additive, f32

    acc = None
    for h in range(num_heads):           # static unroll; H is small & known
        sl = slice(h * dk, (h + 1) * dk)
        qh = q[:, sl].astype(bf16)       # (T, dk)
        kh = k[:, sl].astype(bf16)       # (S, dk)
        vh = v[:, sl].astype(bf16)       # (S, dk)

        s = jax.lax.dot_general(qh, kh, (((1,), (1,)), ((), ())),
                                preferred_element_type=jnp.float32)   # (T, S)
        s = s + bias
        m = jnp.max(s, axis=-1, keepdims=True)
        p = jnp.exp(s - m)                                            # f32
        l = jnp.sum(p, axis=-1, keepdims=True)

        attn = jnp.dot(p.astype(bf16), vh,
                       preferred_element_type=jnp.float32)            # (T, dk)
        attn = attn * pl.reciprocal(l, approx=True)                   # EUP, not VALU divide

        contrib = jnp.dot(attn.astype(bf16), wo_ref[h],
                          preferred_element_type=jnp.float32)         # (T, D)
        acc = contrib if acc is None else acc + contrib

    y = acc + bo_ref[...] + xq           # output proj bias + residual (f32)

    # LayerNorm (f32 statistics)
    mean = jnp.mean(y, axis=-1, keepdims=True)
    yc = y - mean
    var = jnp.mean(yc * yc, axis=-1, keepdims=True)
    inv = jax.lax.rsqrt(var + eps)
    out_ref[0] = yc * inv * g_ref[...] + beta_ref[...]


def mha_ln(xq, xkv, attn_bias, kpad_bias, pa, pln, num_heads, eps=1e-5):
    """xq (B,T,D) f32, xkv (B,S,D) f32, attn_bias (T,S) f32, kpad_bias (B,1,S) f32.
    Returns LayerNorm(attention(xq, xkv, xkv) + xq), shape (B,T,D) f32."""
    B, T, D = xq.shape
    S = xkv.shape[1]
    dk = D // num_heads

    kernel = functools.partial(_mha_ln_kernel, num_heads=num_heads, eps=eps)
    in_specs = [
        pl.BlockSpec((1, T, D), lambda b: (b, 0, 0)),            # xq (per batch)
        pl.BlockSpec((1, S, D), lambda b: (b, 0, 0)),            # xkv (per batch)
        pl.BlockSpec((T, S), lambda b: (0, 0)),                  # additive attn mask (resident)
        pl.BlockSpec((1, 1, S), lambda b: (b, 0, 0)),            # key-padding bias (per batch)
        pl.BlockSpec((D, D), lambda b: (0, 0)),                  # WQ (bf16, scale folded, resident)
        pl.BlockSpec((D, D), lambda b: (0, 0)),                  # WK (bf16, resident)
        pl.BlockSpec((D, D), lambda b: (0, 0)),                  # WV (bf16, resident)
        pl.BlockSpec((num_heads, dk, D), lambda b: (0, 0, 0)),   # WO per-head slabs (bf16, resident)
        pl.BlockSpec((1, D), lambda b: (0, 0)),                  # bq (scaled)
        pl.BlockSpec((1, D), lambda b: (0, 0)),                  # bk
        pl.BlockSpec((1, D), lambda b: (0, 0)),                  # bv
        pl.BlockSpec((1, D), lambda b: (0, 0)),                  # bo
        pl.BlockSpec((1, D), lambda b: (0, 0)),                  # LN gamma
        pl.BlockSpec((1, D), lambda b: (0, 0)),                  # LN beta
    ]
    return pl.pallas_call(
        kernel,
        out_shape=jax.ShapeDtypeStruct((B, T, D), jnp.float32),
        grid=(B,),
        in_specs=in_specs,
        out_specs=pl.BlockSpec((1, T, D), lambda b: (b, 0, 0)),
        compiler_params=pltpu.CompilerParams(
            dimension_semantics=("parallel",),
            vmem_limit_bytes=VMEM_LIMIT),
    )(xq, xkv, attn_bias, kpad_bias,
      pa["wq"], pa["wk"], pa["wv"], pa["wo_heads"],
      pa["bq"], pa["bk"], pa["bv"], pa["bo"],
      pln["gamma"], pln["beta"])


# ----------------------------------------------------------------------------
# Fused position-wise FFN + residual + LayerNorm kernel (row-tiled grid).
# ----------------------------------------------------------------------------
def _ffn_ln_kernel(x_ref, w1_ref, b1_ref, w2_ref, b2_ref, g_ref, beta_ref, out_ref, *, eps):
    bf16 = jnp.bfloat16
    x = x_ref[...]                                               # (tile, D) f32
    h = jax.lax.dot_general(x.astype(bf16), w1_ref[...], (((1,), (1,)), ((), ())),
                            preferred_element_type=jnp.float32) + b1_ref[...]
    h = jnp.maximum(h, 0.0)
    y = jax.lax.dot_general(h.astype(bf16), w2_ref[...], (((1,), (1,)), ((), ())),
                            preferred_element_type=jnp.float32) + b2_ref[...]
    y = y + x                                                    # residual (f32)
    mean = jnp.mean(y, axis=-1, keepdims=True)
    yc = y - mean
    var = jnp.mean(yc * yc, axis=-1, keepdims=True)
    inv = jax.lax.rsqrt(var + eps)
    out_ref[...] = yc * inv * g_ref[...] + beta_ref[...]


def ffn_ln(x, pf, pln, eps=1e-5):
    """LayerNorm(W2(relu(W1 x + b1)) + b2 + x).  x (B,T,D) f32 -> (B,T,D) f32."""
    B, T, D = x.shape
    rows = B * T
    d_ff = pf["w1"].shape[0]
    tile = 512 if rows % 512 == 0 else rows                      # lane-dense D, ~512-row tiles
    xf = x.reshape(rows, D)

    out = pl.pallas_call(
        functools.partial(_ffn_ln_kernel, eps=eps),
        out_shape=jax.ShapeDtypeStruct((rows, D), jnp.float32),
        grid=(rows // tile,),
        in_specs=[
            pl.BlockSpec((tile, D), lambda i: (i, 0)),           # activation rows
            pl.BlockSpec((d_ff, D), lambda i: (0, 0)),           # W1 (bf16, resident)
            pl.BlockSpec((1, d_ff), lambda i: (0, 0)),           # b1
            pl.BlockSpec((D, d_ff), lambda i: (0, 0)),           # W2 (bf16, resident)
            pl.BlockSpec((1, D), lambda i: (0, 0)),              # b2
            pl.BlockSpec((1, D), lambda i: (0, 0)),              # LN gamma
            pl.BlockSpec((1, D), lambda i: (0, 0)),              # LN beta
        ],
        out_specs=pl.BlockSpec((tile, D), lambda i: (i, 0)),
        compiler_params=pltpu.CompilerParams(
            dimension_semantics=("parallel",),
            vmem_limit_bytes=VMEM_LIMIT),
    )(xf, pf["w1"], pf["b1"], pf["w2"], pf["b2"], pln["gamma"], pln["beta"])
    return out.reshape(B, T, D)


# ----------------------------------------------------------------------------
# One-time parameter prep: bf16 weight casts, scale folding, WO head re-layout.
# ----------------------------------------------------------------------------
def prepare_params(params, num_heads):
    d_model = params["self_attn"]["wq"].shape[0]
    d_ff = params["ffn"]["w1"].shape[0]
    dk = d_model // num_heads
    scale = float(dk) ** -0.5
    bf16 = jnp.bfloat16

    def prep_attn(p):
        return dict(
            wq=(p["wq"] * scale).astype(bf16),                       # scale folded in
            wk=p["wk"].astype(bf16),
            wv=p["wv"].astype(bf16),
            # WO^T reshaped into per-head (dk, D) slabs: out = sum_h attn_h @ wo_heads[h]
            wo_heads=p["wo"].T.reshape(num_heads, dk, d_model).astype(bf16),
            bq=(p["bq"] * scale).reshape(1, d_model).astype(jnp.float32),
            bk=p["bk"].reshape(1, d_model),
            bv=p["bv"].reshape(1, d_model),
            bo=p["bo"].reshape(1, d_model),
        )

    def prep_ln(p):
        return dict(gamma=p["gamma"].reshape(1, d_model),
                    beta=p["beta"].reshape(1, d_model))

    return dict(
        self_attn=prep_attn(params["self_attn"]),
        cross_attn=prep_attn(params["cross_attn"]),
        ffn=dict(w1=params["ffn"]["w1"].astype(bf16),
                 b1=params["ffn"]["b1"].reshape(1, d_ff),
                 w2=params["ffn"]["w2"].astype(bf16),
                 b2=params["ffn"]["b2"].reshape(1, d_model)),
        ln1=prep_ln(params["ln1"]),
        ln2=prep_ln(params["ln2"]),
        ln3=prep_ln(params["ln3"]),
    )


# ----------------------------------------------------------------------------
# DecoderLayer forward (module boundary keeps PyTorch's (T,B,D)/(S,B,D) layout).
# ----------------------------------------------------------------------------
def decoder_layer_forward(prep, x_tbd, enc_tbd, self_attn_mask,
                          self_attn_padding_mask, encoder_padding_mask, num_heads):
    T, B, D = x_tbd.shape
    S = enc_tbd.shape[0]

    x = jnp.transpose(x_tbd, (1, 0, 2))        # (B, T, D)
    enc = jnp.transpose(enc_tbd, (1, 0, 2))    # (B, S, D)

    # Small additive biases (no (B,T,S) materialization); clamp -inf to a large
    # finite negative so fully-masked rows can't produce NaN.
    self_bias = jnp.maximum(self_attn_mask.astype(jnp.float32), NEG_BIG)         # (T, T)
    cross_bias = jnp.zeros((T, S), jnp.float32)                                   # no attn_mask
    self_kpad = jnp.where(self_attn_padding_mask, NEG_BIG, 0.0).astype(
        jnp.float32).reshape(B, 1, T)
    enc_kpad = jnp.where(encoder_padding_mask, NEG_BIG, 0.0).astype(
        jnp.float32).reshape(B, 1, S)

    h1 = mha_ln(x, x, self_bias, self_kpad, prep["self_attn"], prep["ln1"], num_heads)
    h2 = mha_ln(h1, enc, cross_bias, enc_kpad, prep["cross_attn"], prep["ln2"], num_heads)
    h3 = ffn_ln(h2, prep["ffn"], prep["ln3"])

    return jnp.transpose(h3, (1, 0, 2))        # back to (T, B, D)


# ----------------------------------------------------------------------------
# Deterministic parameter init (shapes follow the PyTorch module's __init__).
# ----------------------------------------------------------------------------
def init_params(key, d_model, d_ff):
    def lin(k, dout, din):
        kw, kb = jax.random.split(k)
        w = jax.random.normal(kw, (dout, din), jnp.float32) * (1.0 / (din ** 0.5))
        b = jax.random.normal(kb, (dout,), jnp.float32) * 0.02
        return w, b

    def attn(k):
        k1, k2, k3, k4 = jax.random.split(k, 4)
        wq, bq = lin(k1, d_model, d_model)
        wk, bk = lin(k2, d_model, d_model)
        wv, bv = lin(k3, d_model, d_model)
        wo, bo = lin(k4, d_model, d_model)
        return dict(wq=wq, bq=bq, wk=wk, bk=bk, wv=wv, bv=bv, wo=wo, bo=bo)

    def ln(k):
        k1, k2 = jax.random.split(k)
        return dict(gamma=1.0 + 0.1 * jax.random.normal(k1, (d_model,), jnp.float32),
                    beta=0.1 * jax.random.normal(k2, (d_model,), jnp.float32))

    ks = jax.random.split(key, 6)
    kf1, kf2 = jax.random.split(ks[2])
    w1, b1 = lin(kf1, d_ff, d_model)
    w2, b2 = lin(kf2, d_model, d_ff)
    return dict(
        self_attn=attn(ks[0]),
        cross_attn=attn(ks[1]),
        ffn=dict(w1=w1, b1=b1, w2=w2, b2=b2),
        ln1=ln(ks[3]),
        ln2=ln(ks[4]),
        ln3=ln(ks[5]),
    )


# ----------------------------------------------------------------------------
# Pure-JAX reference mirroring the kernel numerics (same prepared params,
# same bf16 operand casts, same mask clamping) for a tight correctness check.
# ----------------------------------------------------------------------------
def _mha_ln_ref(xq, xkv, amask, kpad, pa, pln, num_heads, eps=1e-5):
    bf16 = jnp.bfloat16
    D = xq.shape[-1]
    dk = D // num_heads
    q = jnp.einsum("btd,ed->bte", xq.astype(bf16), pa["wq"],
                   preferred_element_type=jnp.float32) + pa["bq"]
    k = jnp.einsum("bsd,ed->bse", xkv.astype(bf16), pa["wk"],
                   preferred_element_type=jnp.float32) + pa["bk"]
    v = jnp.einsum("bsd,ed->bse", xkv.astype(bf16), pa["wv"],
                   preferred_element_type=jnp.float32) + pa["bv"]
    bias = amask[None, :, :] + kpad                                  # (B, T, S)
    acc = 0.0
    for h in range(num_heads):
        sl = slice(h * dk, (h + 1) * dk)
        s = jnp.einsum("btk,bsk->bts", q[..., sl].astype(bf16), k[..., sl].astype(bf16),
                       preferred_element_type=jnp.float32) + bias
        m = jnp.max(s, axis=-1, keepdims=True)
        p = jnp.exp(s - m)
        l = jnp.sum(p, axis=-1, keepdims=True)
        attn = jnp.einsum("bts,bsk->btk", p.astype(bf16), v[..., sl].astype(bf16),
                          preferred_element_type=jnp.float32) / l
        acc = acc + jnp.einsum("btk,kd->btd", attn.astype(bf16), pa["wo_heads"][h],
                               preferred_element_type=jnp.float32)
    y = acc + pa["bo"] + xq
    mean = y.mean(-1, keepdims=True)
    var = ((y - mean) ** 2).mean(-1, keepdims=True)
    return (y - mean) * jax.lax.rsqrt(var + eps) * pln["gamma"] + pln["beta"]


def _ffn_ln_ref(x, pf, pln, eps=1e-5):
    bf16 = jnp.bfloat16
    h = jnp.einsum("btd,fd->btf", x.astype(bf16), pf["w1"],
                   preferred_element_type=jnp.float32) + pf["b1"]
    h = jnp.maximum(h, 0.0)
    y = jnp.einsum("btf,df->btd", h.astype(bf16), pf["w2"],
                   preferred_element_type=jnp.float32) + pf["b2"]
    y = y + x
    mean = y.mean(-1, keepdims=True)
    var = ((y - mean) ** 2).mean(-1, keepdims=True)
    return (y - mean) * jax.lax.rsqrt(var + eps) * pln["gamma"] + pln["beta"]


def decoder_layer_ref(prep, x_tbd, enc_tbd, self_attn_mask,
                      self_attn_padding_mask, encoder_padding_mask, num_heads):
    T, B, D = x_tbd.shape
    S = enc_tbd.shape[0]
    x = jnp.transpose(x_tbd, (1, 0, 2))
    enc = jnp.transpose(enc_tbd, (1, 0, 2))
    self_bias = jnp.maximum(self_attn_mask.astype(jnp.float32), NEG_BIG)
    cross_bias = jnp.zeros((T, S), jnp.float32)
    self_kpad = jnp.where(self_attn_padding_mask, NEG_BIG, 0.0).astype(
        jnp.float32).reshape(B, 1, T)
    enc_kpad = jnp.where(encoder_padding_mask, NEG_BIG, 0.0).astype(
        jnp.float32).reshape(B, 1, S)
    h1 = _mha_ln_ref(x, x, self_bias, self_kpad, prep["self_attn"], prep["ln1"], num_heads)
    h2 = _mha_ln_ref(h1, enc, cross_bias, enc_kpad, prep["cross_attn"], prep["ln2"], num_heads)
    h3 = _ffn_ln_ref(h2, prep["ffn"], prep["ln3"])
    return jnp.transpose(h3, (1, 0, 2))


if __name__ == "__main__":
    # small shapes: tgt_len=8, src_len=8, batch=2, d_model=32, heads=4, d_ff=64
    T, S, B, D, H, DFF = 8, 8, 2, 32, 4, 64

    root = jax.random.PRNGKey(0)
    kp, kx, ke = jax.random.split(root, 3)
    raw_params = init_params(kp, D, DFF)
    params = prepare_params(raw_params, H)     # one-time prep (bf16, scale fold, WO layout)

    x = jax.random.normal(kx, (T, B, D), jnp.float32)          # decoder input (T, B, D)
    enc_out = jax.random.normal(ke, (S, B, D), jnp.float32)    # encoder output (S, B, D)

    # causal additive self-attention mask (T, T): -inf above diagonal (PyTorch convention)
    idx = jnp.arange(T)
    self_attn_mask = jnp.where(idx[:, None] < idx[None, :],
                               jnp.float32(-jnp.inf), jnp.float32(0.0))
    # boolean key-padding masks (True = padded)
    self_attn_padding_mask = jnp.zeros((B, T), bool).at[:, -1].set(True)
    encoder_padding_mask = jnp.zeros((B, S), bool).at[:, -2:].set(True)

    out = decoder_layer_forward(params, x, enc_out, self_attn_mask,
                                self_attn_padding_mask, encoder_padding_mask, H)
    out = jax.block_until_ready(out)
    assert out.shape == (T, B, D)

    ref = decoder_layer_ref(params, x, enc_out, self_attn_mask,
                            self_attn_padding_mask, encoder_padding_mask, H)
    err = float(jnp.max(jnp.abs(out - ref)))
    # tolerance covers MXU vs XLA accumulation order and the approximate reciprocal
    assert err < 2e-2, f"mismatch vs reference: max abs err = {err}"

    print("KERNEL_OK")
</pallas_src>

<mosaic_0001>
module attributes {stable_mosaic.version = 11 : i64} {
  func.func @_mha_ln_kernel(%arg0: i32, %arg1: memref<1x8x32xf32, #tpu.memory_space<vmem>>, %arg2: memref<1x8x32xf32, #tpu.memory_space<vmem>>, %arg3: memref<8x8xf32, #tpu.memory_space<vmem>>, %arg4: memref<1x1x8xf32, #tpu.memory_space<vmem>>, %arg5: memref<32x32xbf16, #tpu.memory_space<vmem>>, %arg6: memref<32x32xbf16, #tpu.memory_space<vmem>>, %arg7: memref<32x32xbf16, #tpu.memory_space<vmem>>, %arg8: memref<4x8x32xbf16, #tpu.memory_space<vmem>>, %arg9: memref<1x32xf32, #tpu.memory_space<vmem>>, %arg10: memref<1x32xf32, #tpu.memory_space<vmem>>, %arg11: memref<1x32xf32, #tpu.memory_space<vmem>>, %arg12: memref<1x32xf32, #tpu.memory_space<vmem>>, %arg13: memref<1x32xf32, #tpu.memory_space<vmem>>, %arg14: memref<1x32xf32, #tpu.memory_space<vmem>>, %arg15: memref<1x8x32xf32, #tpu.memory_space<vmem>>) attributes {dimension_semantics = [#tpu.dimension_semantics<parallel>], iteration_bounds = array<i64: 2>, scalar_prefetch = 0 : i64, scratch_operands = 0 : i64, tpu.core_type = #tpu.core_type<tc>, window_params = [{transform_indices = @transform_0, window_bounds = array<i64: 1, 8, 32>}, {transform_indices = @transform_1, window_bounds = array<i64: 1, 8, 32>}, {pipeline_mode = #tpu.pipeline_mode<synchronous>, transform_indices = @transform_2, window_bounds = array<i64: 8, 8>}, {transform_indices = @transform_3, window_bounds = array<i64: 1, 1, 8>}, {pipeline_mode = #tpu.pipeline_mode<synchronous>, transform_indices = @transform_4, window_bounds = array<i64: 32, 32>}, {pipeline_mode = #tpu.pipeline_mode<synchronous>, transform_indices = @transform_5, window_bounds = array<i64: 32, 32>}, {pipeline_mode = #tpu.pipeline_mode<synchronous>, transform_indices = @transform_6, window_bounds = array<i64: 32, 32>}, {pipeline_mode = #tpu.pipeline_mode<synchronous>, transform_indices = @transform_7, window_bounds = array<i64: 4, 8, 32>}, {pipeline_mode = #tpu.pipeline_mode<synchronous>, transform_indices = @transform_8, window_bounds = array<i64: 1, 32>}, {pipeline_mode = #tpu.pipeline_mode<synchronous>, transform_indices = @transform_9, window_bounds = array<i64: 1, 32>}, {pipeline_mode = #tpu.pipeline_mode<synchronous>, transform_indices = @transform_10, window_bounds = array<i64: 1, 32>}, {pipeline_mode = #tpu.pipeline_mode<synchronous>, transform_indices = @transform_11, window_bounds = array<i64: 1, 32>}, {pipeline_mode = #tpu.pipeline_mode<synchronous>, transform_indices = @transform_12, window_bounds = array<i64: 1, 32>}, {pipeline_mode = #tpu.pipeline_mode<synchronous>, transform_indices = @transform_13, window_bounds = array<i64: 1, 32>}, {transform_indices = @transform_14, window_bounds = array<i64: 1, 8, 32>}]} {
    %c0 = arith.constant 0 : index
    %c0_0 = arith.constant 0 : index
    %c0_1 = arith.constant 0 : index
    %0 = vector.load %arg1[%c0, %c0_0, %c0_1] : memref<1x8x32xf32, #tpu.memory_space<vmem>>, vector<1x8x32xf32>
    %1 = vector.shape_cast %0 : vector<1x8x32xf32> to vector<8x32xf32>
    %c0_2 = arith.constant 0 : index
    %c0_3 = arith.constant 0 : index
    %c0_4 = arith.constant 0 : index
    %2 = vector.load %arg2[%c0_2, %c0_3, %c0_4] : memref<1x8x32xf32, #tpu.memory_space<vmem>>, vector<1x8x32xf32>
    %3 = vector.shape_cast %2 : vector<1x8x32xf32> to vector<8x32xf32>
    %4 = arith.truncf %1 : vector<8x32xf32> to vector<8x32xbf16>
    %5 = arith.truncf %3 : vector<8x32xf32> to vector<8x32xbf16>
    %c0_5 = arith.constant 0 : index
    %c0_6 = arith.constant 0 : index
    %6 = vector.load %arg5[%c0_5, %c0_6] : memref<32x32xbf16, #tpu.memory_space<vmem>>, vector<32x32xbf16>
    %cst = arith.constant dense<0.000000e+00> : vector<8x32xf32>
    %7 = tpu.matmul %4, %6, %cst {dimension_numbers = #tpu.dot_dimension_numbers<[1], [1], [0], [0], [0, 0, 1, 0], [], []>} : vector<8x32xbf16>, vector<32x32xbf16>, vector<8x32xf32> -> vector<8x32xf32>
    %c0_7 = arith.constant 0 : index
    %c0_8 = arith.constant 0 : index
    %8 = vector.load %arg9[%c0_7, %c0_8] : memref<1x32xf32, #tpu.memory_space<vmem>>, vector<1x32xf32>
    %9 = vector.broadcast %8 : vector<1x32xf32> to vector<8x32xf32>
    %10 = arith.addf %7, %9 : vector<8x32xf32>
    %c0_9 = arith.constant 0 : index
    %c0_10 = arith.constant 0 : index
    %11 = vector.load %arg6[%c0_9, %c0_10] : memref<32x32xbf16, #tpu.memory_space<vmem>>, vector<32x32xbf16>
    %cst_11 = arith.constant dense<0.000000e+00> : vector<8x32xf32>
    %12 = tpu.matmul %5, %11, %cst_11 {dimension_numbers = #tpu.dot_dimension_numbers<[1], [1], [0], [0], [0, 0, 1, 0], [], []>} : vector<8x32xbf16>, vector<32x32xbf16>, vector<8x32xf32> -> vector<8x32xf32>
    %c0_12 = arith.constant 0 : index
    %c0_13 = arith.constant 0 : index
    %13 = vector.load %arg10[%c0_12, %c0_13] : memref<1x32xf32, #tpu.memory_space<vmem>>, vector<1x32xf32>
    %14 = vector.broadcast %13 : vector<1x32xf32> to vector<8x32xf32>
    %15 = arith.addf %12, %14 : vector<8x32xf32>
    %c0_14 = arith.constant 0 : index
    %c0_15 = arith.constant 0 : index
    %16 = vector.load %arg7[%c0_14, %c0_15] : memref<32x32xbf16, #tpu.memory_space<vmem>>, vector<32x32xbf16>
    %cst_16 = arith.constant dense<0.000000e+00> : vector<8x32xf32>
    %17 = tpu.matmul %5, %16, %cst_16 {dimension_numbers = #tpu.dot_dimension_numbers<[1], [1], [0], [0], [0, 0, 1, 0], [], []>} : vector<8x32xbf16>, vector<32x32xbf16>, vector<8x32xf32> -> vector<8x32xf32>
    %c0_17 = arith.constant 0 : index
    %c0_18 = arith.constant 0 : index
    %18 = vector.load %arg11[%c0_17, %c0_18] : memref<1x32xf32, #tpu.memory_space<vmem>>, vector<1x32xf32>
    %19 = vector.broadcast %18 : vector<1x32xf32> to vector<8x32xf32>
    %20 = arith.addf %17, %19 : vector<8x32xf32>
    %c0_19 = arith.constant 0 : index
    %c0_20 = arith.constant 0 : index
    %21 = vector.load %arg3[%c0_19, %c0_20] : memref<8x8xf32, #tpu.memory_space<vmem>>, vector<8x8xf32>
    %c0_21 = arith.constant 0 : index
    %c0_22 = arith.constant 0 : index
    %c0_23 = arith.constant 0 : index
    %22 = vector.load %arg4[%c0_21, %c0_22, %c0_23] : memref<1x1x8xf32, #tpu.memory_space<vmem>>, vector<1x1x8xf32>
    %23 = vector.shape_cast %22 : vector<1x1x8xf32> to vector<1x8xf32>
    %24 = vector.broadcast %23 : vector<1x8xf32> to vector<8x8xf32>
    %25 = arith.addf %21, %24 : vector<8x8xf32>
    %26 = vector.extract_strided_slice %10 {offsets = [0, 0], sizes = [8, 8], strides = [1, 1]} : vector<8x32xf32> to vector<8x8xf32>
    %27 = arith.truncf %26 : vector<8x8xf32> to vector<8x8xbf16>
    %28 = vector.extract_strided_slice %15 {offsets = [0, 0], sizes = [8, 8], strides = [1, 1]} : vector<8x32xf32> to vector<8x8xf32>
    %29 = arith.truncf %28 : vector<8x8xf32> to vector<8x8xbf16>
    %30 = vector.extract_strided_slice %20 {offsets = [0, 0], sizes = [8, 8], strides = [1, 1]} : vector<8x32xf32> to vector<8x8xf32>
    %31 = arith.truncf %30 : vector<8x8xf32> to vector<8x8xbf16>
    %cst_24 = arith.constant dense<0.000000e+00> : vector<8x8xf32>
    %32 = tpu.matmul %27, %29, %cst_24 {dimension_numbers = #tpu.dot_dimension_numbers<[1], [1], [0], [0], [0, 0, 1, 0], [], []>} : vector<8x8xbf16>, vector<8x8xbf16>, vector<8x8xf32> -> vector<8x8xf32>
    %33 = arith.addf %32, %25 : vector<8x8xf32>
    %cst_25 = arith.constant dense<0xFF800000> : vector<8xf32>
    %34 = vector.multi_reduction <maximumf>, %33, %cst_25 [1] : vector<8x8xf32> to vector<8xf32>
    %35 = vector.shape_cast %34 : vector<8xf32> to vector<8x1xf32>
    %36 = vector.broadcast %35 : vector<8x1xf32> to vector<8x8xf32>
    %37 = arith.subf %33, %36 : vector<8x8xf32>
    %38 = math.exp %37 : vector<8x8xf32>
    %cst_26 = arith.constant dense<0.000000e+00> : vector<8xf32>
    %39 = vector.multi_reduction <add>, %38, %cst_26 [1] : vector<8x8xf32> to vector<8xf32>
    %40 = vector.shape_cast %39 : vector<8xf32> to vector<8x1xf32>
    %41 = arith.truncf %38 : vector<8x8xf32> to vector<8x8xbf16>
    %cst_27 = arith.constant dense<0.000000e+00> : vector<8x8xf32>
    %42 = tpu.matmul %41, %31, %cst_27 {dimension_numbers = #tpu.dot_dimension_numbers<[1], [0], [0], [1], [0, 0, 1, 1], [], []>} : vector<8x8xbf16>, vector<8x8xbf16>, vector<8x8xf32> -> vector<8x8xf32>
    %43 = tpu.reciprocal %40 {approx = true} : vector<8x1xf32> -> vector<8x1xf32>
    %44 = vector.broadcast %43 : vector<8x1xf32> to vector<8x8xf32>
    %45 = arith.mulf %42, %44 : vector<8x8xf32>
    %46 = arith.truncf %45 : vector<8x8xf32> to vector<8x8xbf16>
    %c0_28 = arith.constant 0 : index
    %c0_29 = arith.constant 0 : index
    %c0_30 = arith.constant 0 : index
    %47 = vector.load %arg8[%c0_28, %c0_29, %c0_30] : memref<4x8x32xbf16, #tpu.memory_space<vmem>>, vector<1x8x32xbf16>
    %48 = vector.shape_cast %47 : vector<1x8x32xbf16> to vector<8x32xbf16>
    %cst_31 = arith.constant dense<0.000000e+00> : vector<8x32xf32>
    %49 = tpu.matmul %46, %48, %cst_31 {dimension_numbers = #tpu.dot_dimension_numbers<[1], [0], [0], [1], [0, 0, 1, 1], [], []>} : vector<8x8xbf16>, vector<8x32xbf16>, vector<8x32xf32> -> vector<8x32xf32>
    %50 = vector.extract_strided_slice %10 {offsets = [0, 8], sizes = [8, 8], strides = [1, 1]} : vector<8x32xf32> to vector<8x8xf32>
    %51 = arith.truncf %50 : vector<8x8xf32> to vector<8x8xbf16>
    %52 = vector.extract_strided_slice %15 {offsets = [0, 8], sizes = [8, 8], strides = [1, 1]} : vector<8x32xf32> to vector<8x8xf32>
    %53 = arith.truncf %52 : vector<8x8xf32> to vector<8x8xbf16>
    %54 = vector.extract_strided_slice %20 {offsets = [0, 8], sizes = [8, 8], strides = [1, 1]} : vector<8x32xf32> to vector<8x8xf32>
    %55 = arith.truncf %54 : vector<8x8xf32> to vector<8x8xbf16>
    %cst_32 = arith.constant dense<0.000000e+00> : vector<8x8xf32>
    %56 = tpu.matmul %51, %53, %cst_32 {dimension_numbers = #tpu.dot_dimension_numbers<[1], [1], [0], [0], [0, 0, 1, 0], [], []>} : vector<8x8xbf16>, vector<8x8xbf16>, vector<8x8xf32> -> vector<8x8xf32>
    %57 = arith.addf %56, %25 : vector<8x8xf32>
    %cst_33 = arith.constant dense<0xFF800000> : vector<8xf32>
    %58 = vector.multi_reduction <maximumf>, %57, %cst_33 [1] : vector<8x8xf32> to vector<8xf32>
    %59 = vector.shape_cast %58 : vector<8xf32> to vector<8x1xf32>
    %60 = vector.broadcast %59 : vector<8x1xf32> to vector<8x8xf32>
    %61 = arith.subf %57, %60 : vector<8x8xf32>
    %62 = math.exp %61 : vector<8x8xf32>
    %cst_34 = arith.constant dense<0.000000e+00> : vector<8xf32>
    %63 = vector.multi_reduction <add>, %62, %cst_34 [1] : vector<8x8xf32> to vector<8xf32>
    %64 = vector.shape_cast %63 : vector<8xf32> to vector<8x1xf32>
    %65 = arith.truncf %62 : vector<8x8xf32> to vector<8x8xbf16>
    %cst_35 = arith.constant dense<0.000000e+00> : vector<8x8xf32>
    %66 = tpu.matmul %65, %55, %cst_35 {dimension_numbers = #tpu.dot_dimension_numbers<[1], [0], [0], [1], [0, 0, 1, 1], [], []>} : vector<8x8xbf16>, vector<8x8xbf16>, vector<8x8xf32> -> vector<8x8xf32>
    %67 = tpu.reciprocal %64 {approx = true} : vector<8x1xf32> -> vector<8x1xf32>
    %68 = vector.broadcast %67 : vector<8x1xf32> to vector<8x8xf32>
    %69 = arith.mulf %66, %68 : vector<8x8xf32>
    %70 = arith.truncf %69 : vector<8x8xf32> to vector<8x8xbf16>
    %c1 = arith.constant 1 : index
    %c0_36 = arith.constant 0 : index
    %c0_37 = arith.constant 0 : index
    %71 = vector.load %arg8[%c1, %c0_36, %c0_37] : memref<4x8x32xbf16, #tpu.memory_space<vmem>>, vector<1x8x32xbf16>
    %72 = vector.shape_cast %71 : vector<1x8x32xbf16> to vector<8x32xbf16>
    %cst_38 = arith.constant dense<0.000000e+00> : vector<8x32xf32>
    %73 = tpu.matmul %70, %72, %cst_38 {dimension_numbers = #tpu.dot_dimension_numbers<[1], [0], [0], [1], [0, 0, 1, 1], [], []>} : vector<8x8xbf16>, vector<8x32xbf16>, vector<8x32xf32> -> vector<8x32xf32>
    %74 = arith.addf %49, %73 : vector<8x32xf32>
    %75 = vector.extract_strided_slice %10 {offsets = [0, 16], sizes = [8, 8], strides = [1, 1]} : vector<8x32xf32> to vector<8x8xf32>
    %76 = arith.truncf %75 : vector<8x8xf32> to vector<8x8xbf16>
    %77 = vector.extract_strided_slice %15 {offsets = [0, 16], sizes = [8, 8], strides = [1, 1]} : vector<8x32xf32> to vector<8x8xf32>
    %78 = arith.truncf %77 : vector<8x8xf32> to vector<8x8xbf16>
    %79 = vector.extract_strided_slice %20 {offsets = [0, 16], sizes = [8, 8], strides = [1, 1]} : vector<8x32xf32> to vector<8x8xf32>
    %80 = arith.truncf %79 : vector<8x8xf32> to vector<8x8xbf16>
    %cst_39 = arith.constant dense<0.000000e+00> : vector<8x8xf32>
    %81 = tpu.matmul %76, %78, %cst_39 {dimension_numbers = #tpu.dot_dimension_numbers<[1], [1], [0], [0], [0, 0, 1, 0], [], []>} : vector<8x8xbf16>, vector<8x8xbf16>, vector<8x8xf32> -> vector<8x8xf32>
    %82 = arith.addf %81, %25 : vector<8x8xf32>
    %cst_40 = arith.constant dense<0xFF800000> : vector<8xf32>
    %83 = vector.multi_reduction <maximumf>, %82, %cst_40 [1] : vector<8x8xf32> to vector<8xf32>
    %84 = vector.shape_cast %83 : vector<8xf32> to vector<8x1xf32>
    %85 = vector.broadcast %84 : vector<8x1xf32> to vector<8x8xf32>
    %86 = arith.subf %82, %85 : vector<8x8xf32>
    %87 = math.exp %86 : vector<8x8xf32>
    %cst_41 = arith.constant dense<0.000000e+00> : vector<8xf32>
    %88 = vector.multi_reduction <add>, %87, %cst_41 [1] : vector<8x8xf32> to vector<8xf32>
    %89 = vector.shape_cast %88 : vector<8xf32> to vector<8x1xf32>
    %90 = arith.truncf %87 : vector<8x8xf32> to vector<8x8xbf16>
    %cst_42 = arith.constant dense<0.000000e+00> : vector<8x8xf32>
    %91 = tpu.matmul %90, %80, %cst_42 {dimension_numbers = #tpu.dot_dimension_numbers<[1], [0], [0], [1], [0, 0, 1, 1], [], []>} : vector<8x8xbf16>, vector<8x8xbf16>, vector<8x8xf32> -> vector<8x8xf32>
    %92 = tpu.reciprocal %89 {approx = true} : vector<8x1xf32> -> vector<8x1xf32>
    %93 = vector.broadcast %92 : vector<8x1xf32> to vector<8x8xf32>
    %94 = arith.mulf %91, %93 : vector<8x8xf32>
    %95 = arith.truncf %94 : vector<8x8xf32> to vector<8x8xbf16>
    %c2 = arith.constant 2 : index
    %c0_43 = arith.constant 0 : index
    %c0_44 = arith.constant 0 : index
    %96 = vector.load %arg8[%c2, %c0_43, %c0_44] : memref<4x8x32xbf16, #tpu.memory_space<vmem>>, vector<1x8x32xbf16>
    %97 = vector.shape_cast %96 : vector<1x8x32xbf16> to vector<8x32xbf16>
    %cst_45 = arith.constant dense<0.000000e+00> : vector<8x32xf32>
    %98 = tpu.matmul %95, %97, %cst_45 {dimension_numbers = #tpu.dot_dimension_numbers<[1], [0], [0], [1], [0, 0, 1, 1], [], []>} : vector<8x8xbf16>, vector<8x32xbf16>, vector<8x32xf32> -> vector<8x32xf32>
    %99 = arith.addf %74, %98 : vector<8x32xf32>
    %100 = vector.extract_strided_slice %10 {offsets = [0, 24], sizes = [8, 8], strides = [1, 1]} : vector<8x32xf32> to vector<8x8xf32>
    %101 = arith.truncf %100 : vector<8x8xf32> to vector<8x8xbf16>
    %102 = vector.extract_strided_slice %15 {offsets = [0, 24], sizes = [8, 8], strides = [1, 1]} : vector<8x32xf32> to vector<8x8xf32>
    %103 = arith.truncf %102 : vector<8x8xf32> to vector<8x8xbf16>
    %104 = vector.extract_strided_slice %20 {offsets = [0, 24], sizes = [8, 8], strides = [1, 1]} : vector<8x32xf32> to vector<8x8xf32>
    %105 = arith.truncf %104 : vector<8x8xf32> to vector<8x8xbf16>
    %cst_46 = arith.constant dense<0.000000e+00> : vector<8x8xf32>
    %106 = tpu.matmul %101, %103, %cst_46 {dimension_numbers = #tpu.dot_dimension_numbers<[1], [1], [0], [0], [0, 0, 1, 0], [], []>} : vector<8x8xbf16>, vector<8x8xbf16>, vector<8x8xf32> -> vector<8x8xf32>
    %107 = arith.addf %106, %25 : vector<8x8xf32>
    %cst_47 = arith.constant dense<0xFF800000> : vector<8xf32>
    %108 = vector.multi_reduction <maximumf>, %107, %cst_47 [1] : vector<8x8xf32> to vector<8xf32>
    %109 = vector.shape_cast %108 : vector<8xf32> to vector<8x1xf32>
    %110 = vector.broadcast %109 : vector<8x1xf32> to vector<8x8xf32>
    %111 = arith.subf %107, %110 : vector<8x8xf32>
    %112 = math.exp %111 : vector<8x8xf32>
    %cst_48 = arith.constant dense<0.000000e+00> : vector<8xf32>
    %113 = vector.multi_reduction <add>, %112, %cst_48 [1] : vector<8x8xf32> to vector<8xf32>
    %114 = vector.shape_cast %113 : vector<8xf32> to vector<8x1xf32>
    %115 = arith.truncf %112 : vector<8x8xf32> to vector<8x8xbf16>
    %cst_49 = arith.constant dense<0.000000e+00> : vector<8x8xf32>
    %116 = tpu.matmul %115, %105, %cst_49 {dimension_numbers = #tpu.dot_dimension_numbers<[1], [0], [0], [1], [0, 0, 1, 1], [], []>} : vector<8x8xbf16>, vector<8x8xbf16>, vector<8x8xf32> -> vector<8x8xf32>
    %117 = tpu.reciprocal %114 {approx = true} : vector<8x1xf32> -> vector<8x1xf32>
    %118 = vector.broadcast %117 : vector<8x1xf32> to vector<8x8xf32>
    %119 = arith.mulf %116, %118 : vector<8x8xf32>
    %120 = arith.truncf %119 : vector<8x8xf32> to vector<8x8xbf16>
    %c3 = arith.constant 3 : index
    %c0_50 = arith.constant 0 : index
    %c0_51 = arith.constant 0 : index
    %121 = vector.load %arg8[%c3, %c0_50, %c0_51] : memref<4x8x32xbf16, #tpu.memory_space<vmem>>, vector<1x8x32xbf16>
    %122 = vector.shape_cast %121 : vector<1x8x32xbf16> to vector<8x32xbf16>
    %cst_52 = arith.constant dense<0.000000e+00> : vector<8x32xf32>
    %123 = tpu.matmul %120, %122, %cst_52 {dimension_numbers = #tpu.dot_dimension_numbers<[1], [0], [0], [1], [0, 0, 1, 1], [], []>} : vector<8x8xbf16>, vector<8x32xbf16>, vector<8x32xf32> -> vector<8x32xf32>
    %124 = arith.addf %99, %123 : vector<8x32xf32>
    %c0_53 = arith.constant 0 : index
    %c0_54 = arith.constant 0 : index
    %125 = vector.load %arg12[%c0_53, %c0_54] : memref<1x32xf32, #tpu.memory_space<vmem>>, vector<1x32xf32>
    %126 = vector.broadcast %125 : vector<1x32xf32> to vector<8x32xf32>
    %127 = arith.addf %124, %126 : vector<8x32xf32>
    %128 = arith.addf %127, %1 : vector<8x32xf32>
    %cst_55 = arith.constant dense<0.000000e+00> : vector<8xf32>
    %129 = vector.multi_reduction <add>, %128, %cst_55 [1] : vector<8x32xf32> to vector<8xf32>
    %130 = vector.shape_cast %129 : vector<8xf32> to vector<8x1xf32>
    %cst_56 = arith.constant 3.200000e+01 : f32
    %131 = vector.broadcast %cst_56 : f32 to vector<8x1xf32>
    %132 = arith.divf %130, %131 : vector<8x1xf32>
    %133 = vector.broadcast %132 : vector<8x1xf32> to vector<8x32xf32>
    %134 = arith.subf %128, %133 : vector<8x32xf32>
    %135 = arith.mulf %134, %134 : vector<8x32xf32>
    %cst_57 = arith.constant dense<0.000000e+00> : vector<8xf32>
    %136 = vector.multi_reduction <add>, %135, %cst_57 [1] : vector<8x32xf32> to vector<8xf32>
    %137 = vector.shape_cast %136 : vector<8xf32> to vector<8x1xf32>
    %cst_58 = arith.constant 3.200000e+01 : f32
    %138 = vector.broadcast %cst_58 : f32 to vector<8x1xf32>
    %139 = arith.divf %137, %138 : vector<8x1xf32>
    %cst_59 = arith.constant 9.99999974E-6 : f32
    %140 = vector.broadcast %cst_59 : f32 to vector<8x1xf32>
    %141 = arith.addf %139, %140 : vector<8x1xf32>
    %142 = math.rsqrt %141 : vector<8x1xf32>
    %143 = vector.broadcast %142 : vector<8x1xf32> to vector<8x32xf32>
    %144 = arith.mulf %134, %143 : vector<8x32xf32>
    %c0_60 = arith.constant 0 : index
    %c0_61 = arith.constant 0 : index
    %145 = vector.load %arg13[%c0_60, %c0_61] : memref<1x32xf32, #tpu.memory_space<vmem>>, vector<1x32xf32>
    %146 = vector.broadcast %145 : vector<1x32xf32> to vector<8x32xf32>
    %147 = arith.mulf %144, %146 : vector<8x32xf32>
    %c0_62 = arith.constant 0 : index
    %c0_63 = arith.constant 0 : index
    %148 = vector.load %arg14[%c0_62, %c0_63] : memref<1x32xf32, #tpu.memory_space<vmem>>, vector<1x32xf32>
    %149 = vector.broadcast %148 : vector<1x32xf32> to vector<8x32xf32>
    %150 = arith.addf %147, %149 : vector<8x32xf32>
    %c0_64 = arith.constant 0 : index
    %c0_65 = arith.constant 0 : index
    %c0_66 = arith.constant 0 : index
    %151 = vector.load %arg15[%c0_64, %c0_65, %c0_66] : memref<1x8x32xf32, #tpu.memory_space<vmem>>, vector<1x8x32xf32>
    %152 = vector.shape_cast %151 : vector<1x8x32xf32> to vector<8x32xf32>
    %153 = vector.shape_cast %150 : vector<8x32xf32> to vector<1x8x32xf32>
    tpu.vector_store %arg15[%c0_64, %c0_65, %c0_66], %153 {strides = array<i32>} : memref<1x8x32xf32, #tpu.memory_space<vmem>>, vector<1x8x32xf32>,
    return
  }
  func.func @transform_0(%arg0: i32) -> (i32, i32, i32) {
    %c0_i32 = arith.constant 0 : i32
    %c0_i32_0 = arith.constant 0 : i32
    %c0_i32_1 = arith.constant 0 : i32
    return %arg0, %c0_i32, %c0_i32_0 : i32, i32, i32
  }
  func.func @transform_1(%arg0: i32) -> (i32, i32, i32) {
    %c0_i32 = arith.constant 0 : i32
    %c0_i32_0 = arith.constant 0 : i32
    %c0_i32_1 = arith.constant 0 : i32
    return %arg0, %c0_i32, %c0_i32_0 : i32, i32, i32
  }
  func.func @transform_2(%arg0: i32) -> (i32, i32) {
    %c0_i32 = arith.constant 0 : i32
    %c0_i32_0 = arith.constant 0 : i32
    %c0_i32_1 = arith.constant 0 : i32
    return %c0_i32, %c0_i32_0 : i32, i32
  }
  func.func @transform_3(%arg0: i32) -> (i32, i32, i32) {
    %c0_i32 = arith.constant 0 : i32
    %c0_i32_0 = arith.constant 0 : i32
    %c0_i32_1 = arith.constant 0 : i32
    return %arg0, %c0_i32, %c0_i32_0 : i32, i32, i32
  }
  func.func @transform_4(%arg0: i32) -> (i32, i32) {
    %c0_i32 = arith.constant 0 : i32
    %c0_i32_0 = arith.constant 0 : i32
    %c0_i32_1 = arith.constant 0 : i32
    return %c0_i32, %c0_i32_0 : i32, i32
  }
  func.func @transform_5(%arg0: i32) -> (i32, i32) {
    %c0_i32 = arith.constant 0 : i32
    %c0_i32_0 = arith.constant 0 : i32
    %c0_i32_1 = arith.constant 0 : i32
    return %c0_i32, %c0_i32_0 : i32, i32
  }
  func.func @transform_6(%arg0: i32) -> (i32, i32) {
    %c0_i32 = arith.constant 0 : i32
    %c0_i32_0 = arith.constant 0 : i32
    %c0_i32_1 = arith.constant 0 : i32
    return %c0_i32, %c0_i32_0 : i32, i32
  }
  func.func @transform_7(%arg0: i32) -> (i32, i32, i32) {
    %c0_i32 = arith.constant 0 : i32
    %c0_i32_0 = arith.constant 0 : i32
    %c0_i32_1 = arith.constant 0 : i32
    %c0_i32_2 = arith.constant 0 : i32
    return %c0_i32, %c0_i32_0, %c0_i32_1 : i32, i32, i32
  }
  func.func @transform_8(%arg0: i32) -> (i32, i32) {
    %c0_i32 = arith.constant 0 : i32
    %c0_i32_0 = arith.constant 0 : i32
    %c0_i32_1 = arith.constant 0 : i32
    return %c0_i32, %c0_i32_0 : i32, i32
  }
  func.func @transform_9(%arg0: i32) -> (i32, i32) {
    %c0_i32 = arith.constant 0 : i32
    %c0_i32_0 = arith.constant 0 : i32
    %c0_i32_1 = arith.constant 0 : i32
    return %c0_i32, %c0_i32_0 : i32, i32
  }
  func.func @transform_10(%arg0: i32) -> (i32, i32) {
    %c0_i32 = arith.constant 0 : i32
    %c0_i32_0 = arith.constant 0 : i32
    %c0_i32_1 = arith.constant 0 : i32
    return %c0_i32, %c0_i32_0 : i32, i32
  }
  func.func @transform_11(%arg0: i32) -> (i32, i32) {
    %c0_i32 = arith.constant 0 : i32
    %c0_i32_0 = arith.constant 0 : i32
    %c0_i32_1 = arith.constant 0 : i32
    return %c0_i32, %c0_i32_0 : i32, i32
  }
  func.func @transform_12(%arg0: i32) -> (i32, i32) {
    %c0_i32 = arith.constant 0 : i32
    %c0_i32_0 = arith.constant 0 : i32
    %c0_i32_1 = arith.constant 0 : i32
    return %c0_i32, %c0_i32_0 : i32, i32
  }
  func.func @transform_13(%arg0: i32) -> (i32, i32) {
    %c0_i32 = arith.constant 0 : i32
    %c0_i32_0 = arith.constant 0 : i32
    %c0_i32_1 = arith.constant 0 : i32
    return %c0_i32, %c0_i32_0 : i32, i32
  }
  func.func @transform_14(%arg0: i32) -> (i32, i32, i32) {
    %c0_i32 = arith.constant 0 : i32
    %c0_i32_0 = arith.constant 0 : i32
    %c0_i32_1 = arith.constant 0 : i32
    return %arg0, %c0_i32, %c0_i32_0 : i32, i32, i32
  }
}

</mosaic_0001>

<bundles_post_ra>
// kernel: tpu_custom_call.1
= control target key start
LH: loop header
LB: loop body
LE: loop exit
PB: predicated region body
PF: predicated region fallthrough
CT: control target
= control target key end

     0   :  { %s2783_s0 = inlined_call_operand.hbm [shape: f32[2,8,32], index: 0, kind: input, shape index: {}]   ;;  %s2784_s1 = inlined_call_operand.hbm [shape: f32[2,8,32], index: 1, kind: input, shape index: {}]   ;;  %s2785_s2 = inlined_call_operand.hbm [shape: f32[8,8], index: 2, kind: input, shape index: {}]   ;;  %s2786_s3 = inlined_call_operand.vmem [shape: f32[2,1,8], index: 3, kind: input, shape index: {}]   ;;  %s2787_s4 = inlined_call_operand.hbm [shape: bf16[32,32], index: 4, kind: input, shape index: {}]   ;;  %s2788_s5 = inlined_call_operand.vmem [shape: bf16[32,32], index: 5, kind: input, shape index: {}]   ;;  %s2789_s6 = inlined_call_operand.hbm [shape: bf16[32,32], index: 6, kind: input, shape index: {}]   ;;  %s2790_s7 = inlined_call_operand.hbm [shape: bf16[4,8,32], index: 7, kind: input, shape index: {}]   ;;  %s2791_s8 = inlined_call_operand.vmem [shape: f32[1,32], index: 8, kind: input, shape index: {}]   ;;  %s2792_s9 = inlined_call_operand.vmem [shape: f32[1,32], index: 9, kind: input, shape index: {}]   ;;  %s2793_s10 = inlined_call_operand.vmem [shape: f32[1,32], index: 10, kind: input, shape index: {}]   ;;  %s2794_s11 = inlined_call_operand.vmem [shape: f32[1,32], index: 11, kind: input, shape index: {}]   ;;  %s2795_s12 = inlined_call_operand.vmem [shape: f32[1,32], index: 12, kind: input, shape index: {}]   ;;  %s2796_s13 = inlined_call_operand.vmem [shape: f32[1,32], index: 13, kind: input, shape index: {}]   ;;  %s2797_s14 = inlined_call_operand.hbm [shape: f32[2,8,32], index: 14, kind: output, shape index: {}]  }
   0x1   :  { %2806 = sst [smem:[#allocation23_spill]] %s2785_s2 }
   0x2   :  { %2807 = sst [smem:[#allocation24_spill]] %s2787_s4 }
   0x3   :  { %2808 = sst [smem:[#allocation25_spill]] %s2789_s6 }
   0x4   :  { %2809 = sst [smem:[#allocation26_spill]] %s2790_s7 }
   0x5   :  { %2810 = sst [smem:[#allocation27_spill]] %s2794_s11 }
   0x6   :  { %2811 = sst [smem:[#allocation28_spill]] %s2795_s12 }
   0x7   :  { %2812 = sst [smem:[#allocation29_spill]] %s2796_s13 }
   0x8   :  { %2813 = sst [smem:[#allocation30_spill]] %s2797_s14 }
   0x9   :  { %19 = vsyncpa [#allocation3], 0 }
   0xa   :  { %21 = vsyncpa [#allocation3 + $0x1], 0 }
   0xb   :  { %22 = vsyncpa [#allocation6], 0 }
   0xc   :  { %24 = vsyncpa [#allocation6 + $0x1], 0 }
   0xd   :  { %25 = vsyncpa [#allocation9], 0 }
   0xe   :  { %26 = vsyncpa [#allocation12], 0 }
   0xf   :  { %27 = vsyncpa [#allocation4], 0 }
  0x10   :  { %29 = vsyncpa [#allocation4 + $0x1], 0  ;;  %s2293_s29 = smov 0   ;;  %s2295_s30 = smov 0  }
  0x11   :  { %s2297_s15 = smov 0   ;;  %s2299_s16 = smov 0  }
  0x12 LB: > { %2814 = sst [smem:[#allocation20_spill]] %s2198_s15  ;;  %s2204_s17 = smov [#allocation7]   ;;  %s2202_s16 = sphi %s2299_s16, %s2845_s16   ;;  %s2198_s15 = sphi %s2297_s15, %s2847_s15   ;;  %s2194_s30 = sphi %s2295_s30, %s2849_s30   ;;  %s2190_s29 = sphi %s2293_s29, %s2848_s29  }
  0x13   : > { %s388_s18 = sshll.u32 %s2204_s17, 4  ;;  %s2314_s19 = sadd.s32 4294967295, %s2202_s16   ;;  %s389_s18 = int_to_ptr.vmem [resolvable:$true] %s388_s18 }
  0x14   : > { %p1646_p0 = scmp.ge.s32.totalorder %s2202_s16, 1  ;;  %p2799_p1 = scmp.eq.s32.totalorder %s2314_s19, 0 }
  0x15   : > { %p375_p2 = scmp.lt.s32.totalorder %s2202_s16, 3  ;;  %s2205_s21 = smov [#allocation8]  }
  0x16   : > { %s398_s22 = sshll.u32 %s2205_s21, 4  ;;  %s2206_s24 = smov [#allocation10]   ;;  %s2326_s22 = int_to_ptr.vmem [resolvable:$true] %s398_s22 }
  0x17   : > { %p2319_p3 = pnand %p1646_p0, %p375_p2  ;;  %s414_s25 = sshll.u32 %s2206_s24, 4  ;;  %s2334_s25 = int_to_ptr.vmem [resolvable:$true] %s414_s25 }
  0x18   : > { %s2817_s2 = sld [smem:[#allocation23_spill]] }
  0x19   : > { %s2815_s20 = scalar_select %p2319_p3, 1, 0 }
  0x1a   : > { %p1847_p5 = pneg %p2319_p3 }
  0x1c   : > { %p2330_p6 = pnand %p1847_p5, %p2799_p1 }
  0x1e   : > { %s1948_s28 = scalar_lea.hbm %s2817_s2, 128  ;;  %p2344_p8 = pneg %p2330_p6 }
  0x1f   : > { %p1949_p7 = scmp.ne.s32.totalorder %s2817_s2, %s1948_s28  ;;  %p1955_p11 = scmp.lt.u32.totalorder %s1948_s28, %s2817_s2 }
  0x21   : > { %p1951_p9 = pnand %p2344_p8, %p1949_p7 }
  0x23   : > { %p1952_p10 = pneg %p1951_p9 }
  0x25   : > { %p1957_p12 = pnand %p1955_p11, %p1952_p10 }
  0x27   : > { %1960 = shalt.err (!%p1957_p12)
}
  0x28   : > { %s1961_s26 = scalar_lea.vmem %s389_s18, 128  ;;  %p1969_p5 = scmp.lt.s32.totalorder %s389_s18, %s389_s18 }
  0x29   : > { %p1962_p13 = scmp.ne.s32.totalorder %s389_s18, %s1961_s26  ;;  %p1970_p4 = scmp.lt.s32.totalorder %s1961_s26, %s1961_s26 }
  0x2b   : > { %p1964_p0 = pnand %p1962_p13, %p2344_p8  ;;  %p1971_p1 = por %p1970_p4, %p1969_p5 }
  0x2d   : > { %p1965_p2 = pneg %p1964_p0 }
  0x2f   : > { %p1972_p3 = pnand %p1971_p1, %p1965_p2 }
  0x31   : > { %1975 = shalt.err (!%p1972_p3)
}
  0x32   : > { %1850 = dma.hbm_to_vmem [thread:$0]  (!%p2330_p6), %s2817_s2, 128, %s389_s18, [#allocation6]  }
  0x33   : > { %s2819_s4 = sld [smem:[#allocation24_spill]] }
  0x39   : > { %s1976_s17 = scalar_lea.hbm %s2819_s4, 256 }
  0x3a   : > { %p1977_p7 = scmp.ne.s32.totalorder %s2819_s4, %s1976_s17  ;;  %p1983_p1 = scmp.lt.u32.totalorder %s1976_s17, %s2819_s4 }
  0x3c   : > { %p1979_p9 = pnand %p1977_p7, %p2344_p8 }
  0x3e   : > { %p1980_p4 = pneg %p1979_p9 }
  0x40   : > { %p1985_p3 = pnand %p1983_p1, %p1980_p4 }
  0x42   : > { %1988 = shalt.err (!%p1985_p3)
}
  0x43   : > { %s1989_s18 = scalar_lea.vmem %s2326_s22, 256  ;;  %p1997_p13 = scmp.lt.s32.totalorder %s2326_s22, %s2326_s22 }
  0x44   : > { %p1990_p10 = scmp.ne.s32.totalorder %s2326_s22, %s1989_s18  ;;  %p1998_p0 = scmp.lt.s32.totalorder %s1989_s18, %s1989_s18 }
  0x46   : > { %p1992_p11 = pnand %p1990_p10, %p2344_p8  ;;  %p1999_p2 = por %p1998_p0, %p1997_p13 }
  0x48   : > { %p1993_p12 = pneg %p1992_p11 }
  0x4a   : > { %p2000_p5 = pnand %p1999_p2, %p1993_p12 }
  0x4c   : > { %2003 = shalt.err (!%p2000_p5)
}
  0x4d   : > { %s2207_s12 = smov 64   ;;  %s2208_s11 = smov 4  }
  0x4e   : > { %1853 = dma.hbm_to_vmem [thread:$0]  (!%p2330_p6), %s2819_s4, 256, %s2326_s22, [#allocation9], %s2207_s12, %s2207_s12, %s2208_s11  }
  0x4f   : > { %s2820_s6 = sld [smem:[#allocation25_spill]] }
  0x55   : > { %s2004_s17 = scalar_lea.hbm %s2820_s6, 256 }
  0x56   : > { %p2005_p7 = scmp.ne.s32.totalorder %s2820_s6, %s2004_s17  ;;  %p2011_p1 = scmp.lt.u32.totalorder %s2004_s17, %s2820_s6 }
  0x58   : > { %p2007_p9 = pnand %p2005_p7, %p2344_p8 }
  0x5a   : > { %p2008_p4 = pneg %p2007_p9 }
  0x5c   : > { %p2013_p3 = pnand %p2011_p1, %p2008_p4 }
  0x5e   : > { %2016 = shalt.err (!%p2013_p3)
}
  0x5f   : > { %s2017_s22 = scalar_lea.vmem %s2334_s25, 256  ;;  %p2025_p13 = scmp.lt.s32.totalorder %s2334_s25, %s2334_s25 }
  0x60   : > { %p2018_p10 = scmp.ne.s32.totalorder %s2334_s25, %s2017_s22  ;;  %p2026_p0 = scmp.lt.s32.totalorder %s2017_s22, %s2017_s22 }
  0x62   : > { %p2020_p11 = pnand %p2018_p10, %p2344_p8  ;;  %p2027_p2 = por %p2026_p0, %p2025_p13 }
  0x64   : > { %p2021_p12 = pneg %p2020_p11 }
  0x66   : > { %p2028_p5 = pnand %p2027_p2, %p2021_p12 }
  0x68   : > { %2031 = shalt.err (!%p2028_p5)
}
  0x69   : > { %1856 = dma.hbm_to_vmem [thread:$0]  (!%p2330_p6), %s2820_s6, 256, %s2334_s25, [#allocation9], %s2207_s12, %s2207_s12, %s2208_s11  }
  0x6a   : > { %s2209_s27 = smov [#allocation11]   ;;  %s2821_s7 = sld [smem:[#allocation26_spill]] }
  0x6b   : > { %s427_s13 = sshll.u32 %s2209_s27, 4  ;;  %s428_s13 = int_to_ptr.vmem [resolvable:$true] %s427_s13 }
  0x70   : > { %s2032_s24 = scalar_lea.hbm %s2821_s7, 256 }
  0x71   : > { %p2033_p7 = scmp.ne.s32.totalorder %s2821_s7, %s2032_s24  ;;  %p2039_p1 = scmp.lt.u32.totalorder %s2032_s24, %s2821_s7 }
  0x73   : > { %p2035_p9 = pnand %p2033_p7, %p2344_p8 }
  0x75   : > { %p2036_p4 = pneg %p2035_p9 }
  0x77   : > { %p2041_p3 = pnand %p2039_p1, %p2036_p4 }
  0x79   : > { %2044 = shalt.err (!%p2041_p3)
}
  0x7a   : > { %s2045_s25 = scalar_lea.vmem %s428_s13, 256  ;;  %p2053_p13 = scmp.lt.s32.totalorder %s428_s13, %s428_s13 }
  0x7b   : > { %p2046_p10 = scmp.ne.s32.totalorder %s428_s13, %s2045_s25  ;;  %p2054_p0 = scmp.lt.s32.totalorder %s2045_s25, %s2045_s25 }
  0x7d   : > { %p2048_p11 = pnand %p2046_p10, %p2344_p8  ;;  %p2055_p2 = por %p2054_p0, %p2053_p13 }
  0x7f   : > { %p2049_p12 = pneg %p2048_p11 }
  0x81   : > { %p2056_p5 = pnand %p2055_p2, %p2049_p12 }
  0x83   : > { %2059 = shalt.err (!%p2056_p5)
}
  0x84   : > { %1859 = dma.hbm_to_vmem [thread:$0]  (!%p2330_p6), %s2821_s7, 256, %s428_s13, [#allocation12], %s2207_s12, %s2207_s12, %s2208_s11  }
  0x85   : > { %s1645_s23 = sadd.s32 4294967294, %s2202_s16   ;;  %s2435_s21 = sadd.s32 1, %s2202_s16  }
  0x86   : > { %2822 = sst [smem:[#allocation21_spill]] %s2435_s21  ;;  %s39_s14 = ssub.s32 %s2202_s16, %s2435_s21 }
  0x87   : > { %s42_s27 = sadd.s32 1, %s2198_s15  ;;  %p40_p8 = scmp.eq.s32.totalorder %s39_s14, 0 }
  0x88   : > { %p49_p7 = scmp.ne.s32.totalorder %s2198_s15, %s2194_s30  ;;  %p50_p9 = scmp.eq.s32.totalorder %s2202_s16, 0 }
  0x89   : > { %p55_p4 = scmp.ne.s32.totalorder %s2194_s30, %s2190_s29  ;;  %p2825_p3 = scmp.eq.s32.totalorder %s2314_s19, 0 }
  0x8a   : > { %s2446_s28 = scalar_select %p40_p8, %s2198_s15, %s42_s27  }
  0x8b   : > { %p2448_p1 = por %p50_p9, %p49_p7  ;;  %p2454_p6 = por %p2825_p3, %p55_p4 }
  0x8c   : > { %2823 = sst [smem:[#allocation22_spill]] %s2446_s28  ;;  %p362_p10 = scmp.eq.s32.totalorder %s2314_s19, 1 }
  0x8d   : > { %s2826_s12 = scalar_select %p2454_p6, 1, 0 }
  0x8e   : > { %p368_p11 = scmp.eq.s32.totalorder %s1645_s23, 1  ;;  %p1875_p12 = scmp.lt.s32.totalorder %s2202_s16, 2 }
  0x8f   : > { %s459_s11 = sand.u32 1, %s2198_s15   ;;  %p2461_p13 = por %p362_p10, %p49_p7 }
  0x90   : > { %p2465_p0 = por %p368_p11, %p55_p4  ;;  %s2469_s26 = sshll.u32 %s459_s11, 3 }
  0x91   : > { %s2827_s13 = scalar_select %p2461_p13, 1, 0 }
  0x92   : > { %s2828_s24 = scalar_select %p2465_p0, 1, 0 }
  0x93   : > { %s1653_s18 = sshll.u32 %s2202_s16, 7  ;;  %s463_s2 = scalar_lea.vmem [#allocation2], %s2469_s26 }
  0x94   : > { %s2475_s4 = scalar_lea.hbm %s2783_s0, %s1653_s18  ;;  %s470_s23 = sshll.u32 %s463_s2, 4  ;;  %s2478_s23 = int_to_ptr.vmem [resolvable:$true] %s470_s23 }
  0x95   : > { %p2482_p2 = pnand %p1875_p12, %p2448_p1  ;;  %s2489_s22 = scalar_lea.hbm %s2784_s1, %s1653_s18 }
  0x96   : > { %s477_s25 = sand.u32 1, %s2202_s16   ;;  %s460_s7 = scalar_lea.sflag [#allocation3], %s459_s11 }
  0x97   : > { %s2060_s28 = scalar_lea.hbm %s2475_s4, 128  ;;  %p2062_p8 = pneg %p2482_p2 }
  0x98   : > { %p2061_p5 = scmp.ne.s32.totalorder %s2475_s4, %s2060_s28  ;;  %s2065_s15 = scalar_lea.hbm %s2783_s0, 256 }
  0x99   : > { %p2066_p4 = scmp.lt.u32.totalorder %s2475_s4, %s2783_s0  ;;  %p2067_p1 = scmp.lt.u32.totalorder %s2065_s15, %s2060_s28 }
  0x9a   : > { %p2063_p7 = pnand %p2062_p8, %p2061_p5  ;;  %p2069_p10 = scmp.lt.u32.totalorder %s2060_s28, %s2475_s4 }
  0x9b   : > { %p2068_p3 = por %p2067_p1, %p2066_p4 }
  0x9c   : > { %p2064_p9 = pneg %p2063_p7 }
  0x9d   : > { %p2070_p11 = por %p2069_p10, %p2068_p3 }
  0x9f   : > { %p2071_p12 = pnand %p2070_p11, %p2064_p9 }
  0xa1   : > { %2074 = shalt.err (!%p2071_p12)
}
  0xa2   : > { %s2075_s11 = scalar_lea.vmem %s2478_s23, 128  ;;  %s2210_s18 = smov [#allocation2]  }
  0xa3   : > { %p2076_p5 = scmp.ne.s32.totalorder %s2478_s23, %s2075_s11  ;;  %s2080_s27 = sshll.u32 %s2210_s18, 4  ;;  %s2081_s27 = int_to_ptr.vmem [resolvable:$false] %s2080_s27 }
  0xa4   : > { %s2082_s21 = scalar_lea.vmem %s2081_s27, 256  ;;  %p2083_p13 = scmp.lt.s32.totalorder %s2478_s23, %s2081_s27 }
  0xa5   : > { %p2078_p7 = pnand %p2076_p5, %p2062_p8  ;;  %p2084_p4 = scmp.lt.s32.totalorder %s2082_s21, %s2075_s11 }
  0xa7   : > { %p2079_p0 = pneg %p2078_p7  ;;  %p2085_p1 = por %p2084_p4, %p2083_p13 }
  0xa9   : > { %p2086_p3 = pnand %p2085_p1, %p2079_p0 }
  0xab   : > { %2089 = shalt.err (!%p2086_p3)
}
  0xac   : > { %1863 = dma.hbm_to_vmem [thread:$0]  (!%p2482_p2), %s2475_s4, 128, %s2478_s23, %s460_s7  }
  0xad   : > { %s481_s15 = scalar_lea.vmem [#allocation5], %s2469_s26  ;;  %s478_s17 = scalar_lea.sflag [#allocation6], %s477_s25 }
  0xae   : > { %s488_s28 = sshll.u32 %s481_s15, 4  ;;  %s2090_s2 = scalar_lea.hbm %s2489_s22, 128  ;;  %s489_s28 = int_to_ptr.vmem [resolvable:$true] %s488_s28 }
  0xaf   : > { %p2091_p13 = scmp.ne.s32.totalorder %s2489_s22, %s2090_s2  ;;  %s2095_s18 = scalar_lea.hbm %s2784_s1, 256 }
  0xb0   : > { %p2096_p10 = scmp.lt.u32.totalorder %s2489_s22, %s2784_s1  ;;  %p2097_p11 = scmp.lt.u32.totalorder %s2095_s18, %s2090_s2 }
  0xb1   : > { %p2093_p0 = pnand %p2091_p13, %p2062_p8  ;;  %p2099_p5 = scmp.lt.u32.totalorder %s2090_s2, %s2489_s22 }
  0xb2   : > { %p2098_p12 = por %p2097_p11, %p2096_p10 }
  0xb3   : > { %p2094_p9 = pneg %p2093_p0 }
  0xb4   : > { %p2100_p7 = por %p2099_p5, %p2098_p12 }
  0xb6   : > { %p2101_p4 = pnand %p2100_p7, %p2094_p9 }
  0xb8   : > { %2104 = shalt.err (!%p2101_p4)
}
  0xb9   : > { %s2105_s7 = scalar_lea.vmem %s489_s28, 128  ;;  %s2211_s26 = smov [#allocation5]  }
  0xba   : > { %p2106_p1 = scmp.ne.s32.totalorder %s489_s28, %s2105_s7  ;;  %s2110_s4 = sshll.u32 %s2211_s26, 4  ;;  %s2111_s4 = int_to_ptr.vmem [resolvable:$false] %s2110_s4 }
  0xbb   : > { %s2112_s23 = scalar_lea.vmem %s2111_s4, 256  ;;  %p2113_p0 = scmp.lt.s32.totalorder %s489_s28, %s2111_s4 }
  0xbc   : > { %p2108_p3 = pnand %p2106_p1, %p2062_p8  ;;  %p2114_p6 = scmp.lt.s32.totalorder %s2112_s23, %s2105_s7 }
  0xbe   : > { %p2109_p13 = pneg %p2108_p3  ;;  %p2115_p10 = por %p2114_p6, %p2113_p0 }
  0xc0   : > { %p2116_p11 = pnand %p2115_p10, %p2109_p13 }
  0xc2   : > { %2119 = shalt.err (!%p2116_p11)
}
  0xc3   : > { %1866 = dma.hbm_to_vmem [thread:$0]  (!%p2482_p2), %s2489_s22, 128, %s489_s28, %s478_s17  }
  0xc4   : > { %p2830_p9 = scmp.ne.s32.totalorder %s2815_s20, 0 }
  0xc5   : > { %s2542_s25 = sand.u32 (!%p2830_p9), 1, %s2194_s30   ;;  %p2831_p6 = scmp.ne.s32.totalorder (!%p2830_p9), %s2826_s12, 0 }
  0xc6   : > { %503 = sbr.rel (%p2830_p9) target bundleno = 2690 (0xa82), region = 76  ;;  %s2545_s15 = sshll.u32 (!%p2830_p9), %s2542_s25, 3 }
  0xc7   : > { %s506_s2 = scalar_lea.sflag (!%p2830_p9), [#allocation3], %s2542_s25  ;;  %s509_s6 = scalar_lea.vmem (!%p2830_p9), [#allocation2], %s2545_s15 }
  0xcd   : > { %2165 = dma.done.wait (%p2831_p6), %s506_s2, 128  }
  0xce   : > { %2167 = vsyncadd (%p2831_p6), %s506_s2, 4294967168  ;;  %s514_s20 = sand.u32 1, %s2314_s19   ;;  %s518_s22 = scalar_lea.vmem [#allocation5], %s2545_s15 }
  0xcf   : > { %s515_s14 = scalar_lea.sflag [#allocation6], %s514_s20 }
  0xd0   : > { %2169 = dma.done.wait (%p2831_p6), %s515_s14, 128  }
  0xd1   : > { %2171 = vsyncadd (%p2831_p6), %s515_s14, 4294967168  ;;  %p2832_p2 = scmp.eq.s32.totalorder %s2314_s19, 0 }
  0xd3   : > { %2173 = dma.done.wait (%p2832_p2), [#allocation6], 128   ;;  %p2833_p8 = pmov %p2832_p2 }
  0xd4   : > { %p2834_p12 = pmov %p2832_p2 }
  0xd5   : > { %2175 = vsyncadd (%p2833_p8), [#allocation6], 4294967168 }
  0xd6   : > { %2177 = dma.done.wait (%p2834_p12), [#allocation9], 512   ;;  %p2835_p5 = pmov %p2832_p2 }
  0xd7   : > { %p2836_p7 = pmov %p2832_p2 }
  0xd8   : > { %2179 = vsyncadd (%p2835_p5), [#allocation9], 4294966784 }
  0xd9   : > { %2181 = dma.done.wait (%p2836_p7), [#allocation12], 256   ;;  %p2837_p4 = pmov %p2832_p2 }
  0xda   : > { %v2212_v0 = vmov 0.0   ;;  %vm2213_vm0 = vmmov 0   ;;  %vm616_vm1 = vcmask 261120   ;;  %v1924_v1 = vld [vmem:[#allocation8] sm:$0xff]   ;;  %v1925_v2 = vld [vmem:[%s2788_s5] sm:$0xff]   ;;  %v1926_v5 = vld [vmem:[#allocation8 + $0x8] sm:$0xff]  }
  0xdb   : > { %2183 = vsyncadd (%p2837_p4), [#allocation12], 4294967040  ;;  %1729 = vmatprep.subr.bf16.mxu0 %v2212_v0  ;;  %1737 = vmatprep.subr.bf16.mxu1 %v2212_v0  ;;  %v621_v3 = vsel %vm616_vm1, %v1924_v1, 0  ;;  %v691_v4 = vsel %vm616_vm1, %v1925_v2, 0  ;;  %v1927_v6 = vld [vmem:[%s2788_s5 + $0x8] sm:$0xff]   ;;  %v624_v7 = vsel %vm616_vm1, %v1926_v5, 0 }
  0xdc   : > { %1741 = vmatprep.mubr.msk.bf16.mxu1 %vm2213_vm0, %v2212_v0  ;;  %1733 = vmatprep.mubr.msk.bf16.mxu0 %vm2213_vm0, %v2212_v0  ;;  %v694_v8 = vsel %vm616_vm1, %v1927_v6, 0  ;;  %v2591_v9 = vld [vmem:[%s509_s6] sm:$0xff]  ;;  %v592_v10 = vld [vmem:[%s518_s22] sm:$0xff]  ;;  %vm815_vm2 = vcmask 64512   ;;  %s2214_s26 = smov 120   ;;  %s2215_s2 = smov 112  }
  0xdd   : > { %1730 = vmatpush3.bf16.xpose.msra.mxu0 %v621_v3  ;;  %1738 = vmatpush3.bf16.xpose.msra.mxu1 %v691_v4  ;;  %v1928_v11 = vld [vmem:[#allocation10] sm:$0xff]   ;;  %v593_v12 = vpack.c.bf16 %v2591_v9, %v2591_v9  ;;  %v594_v13 = vpack.c.bf16 %v592_v10, %v592_v10  ;;  %v1929_v15 = vld [vmem:[#allocation10 + $0x8] sm:$0xff]   ;;  %vm875_vm3 = vcmask 1043456   ;;  %p587_p1 = scmp.lt.s32.totalorder %s2314_s19, 1  ;;  %s2216_s12 = smov 104  }
  0xde   : > { %1731 = vmatprep.subr.bf16.mxu0 %v2212_v0  ;;  %1739 = vmatprep.subr.bf16.mxu1 %v2212_v0  ;;  %v758_v14 = vsel %vm616_vm1, %v1928_v11, 0  ;;  %v761_v16 = vsel %vm616_vm1, %v1929_v15, 0  ;;  %v1668_v17 = vld [vmem:[%s2792_s9] ss:$0 sm:$0xff]  ;;  %v922_v6 = vld [vmem:[#allocation11] sm:$0xf] }
  0xdf   : > { %v1664_v18 = vld [vmem:[%s2791_s8] ss:$0 sm:$0xff]  ;;  %s588_s6 = scalar_select %p587_p1, %s2314_s19, 1  ;;  %v1089_v11 = vsel %vm875_vm3, %v922_v6, 0 }
  0xe0   : > { %v1672_v32 = vld [vmem:[%s2793_s10] ss:$0 sm:$0xff]  ;;  %s2838_s11 = sld [smem:[#allocation27_spill]]  ;;  %s2839_s21 = sld [smem:[#allocation28_spill]] }
  0xe1   : > { %s589_s22 = scalar_lea.vmem %s2786_s3, %s588_s6  ;;  %v803_v43 = vld [vmem:[#allocation7] sm:$0xff]  ;;  %s2840_s4 = sld [smem:[#allocation29_spill]] }
  0xe2   : > { %v1676_v44 = vld [vmem:[%s589_s22] ss:$0 sm:$0xff]  ;;  %s1693_s23 = sshll.u32 %s2314_s19, 7  ;;  %s2841_s22 = sld [smem:[#allocation30_spill]] }
  0xe3   : > { %v2652_v45 = vadd.f32 %v1676_v44, %v803_v43  ;;  %s1492_s28 = scalar_lea.sflag [#allocation4], %s2542_s25  ;;  %p2842_p13 = scmp.ne.s32.totalorder %s2827_s13, 0 }
  0xe4   : > { %s2217_s19 = smov [#allocation13]  }
  0xe5   : > { %1732 = vmatpush3.bf16.xpose.msra.mxu0 %v624_v7  ;;  %1740 = vmatpush3.bf16.xpose.msra.mxu1 %v694_v8 }
  0xe6   : > { %1745 = vmatprep.subr.bf16.mxu0 %v2212_v0  ;;  %1753 = vmatprep.subr.bf16.mxu1 %v2212_v0 }
  0xec   : > { %1734 = vmatmul.mubr.msk.bf16.vlgmr.msra.gmra.mrb[0].mxu0 %vm616_vm1, %v593_v12  ;;  %1742 = vmatmul.mubr.msk.bf16.vlgmr.msra.gmra.mrb[0].mxu1 %vm616_vm1, %v594_v13  ;;  %v1038_v12 = vld [vmem:[#allocation11 + $0x4] sm:$0xf] }
  0xed   : > { %1746 = vmatpush3.bf16.xpose.msra.mxu0 %v758_v14  ;;  %1749 = vmatprep.mubr.msk.bf16.mxu0 %vm2213_vm0, %v2212_v0 }
  0xee   : > { %1747 = vmatprep.subr.bf16.mxu0 %v2212_v0  ;;  %1755 = vmatprep.mubr.msk.bf16.mxu1 %vm2213_vm0, %v2212_v0 }
  0xf5   : > { %1748 = vmatpush3.bf16.xpose.msra.mxu0 %v761_v16 }
  0xf6   : > { %1765 = vmatprep.subr.bf16.mxu0 %v2212_v0 }
  0xfc   : > { %1750 = vmatmul.mubr.msk.bf16.vlgmr.msra.gmra.mrb[4].mxu0 %vm616_vm1, %v594_v13  ;;  %v1043_v13 = vsel %vm875_vm3, %v1038_v12, 0 }
  0xfd   : > { %1767 = vmatprep.mubr.msk.bf16.mxu0 %vm2213_vm0, %v2212_v0 }
 0x1bf   : > { %v660_v19 = vpop.f32.mrb[0].mxu0  ;;  %v730_v20 = vpop.f32.mrb[0].mxu1 }
 0x1c0   : > { %v1735_v21 = vpop.f32.mrb[1].mxu0  ;;  %v731_v22 = vadd.f32 %v1668_v17, %v730_v20  ;;  %v1743_v23 = vpop.f32.mrb[1].mxu1  ;;  %v661_v24 = vadd.f32 %v1664_v18, %v660_v19 }
 0x1c1   : > { %v663_v25 = vpop.f32.mrb[2].mxu0  ;;  %v733_v26 = vpop.f32.mrb[2].mxu1 }
 0x1c2   : > { %v1736_v27 = vpop.f32.mrb[3].mxu0  ;;  %v2618_v28 = vpack.c.bf16 %v731_v22, %v731_v22  ;;  %v1744_v29 = vpop.f32.mrb[3].mxu1  ;;  %v2621_v30 = vpack.c.bf16 %v661_v24, %v661_v24 }
 0x1c4   : > { %927 = vrot.lane.b32.xlu0 %v2618_v28, %s2214_s26  ;;  %v820_v31 = vsel %vm815_vm2, %v2618_v28, 0 }
 0x1c5   : > { %1754 = vmatpush3.bf16.xpose.msra.mxu1 %v820_v31 }
 0x1c6   : > { %1759 = vmatprep.subr.bf16.mxu1 %v2212_v0 }
 0x1c8   : > { %924 = vrot.lane.b32.xlu0 %v2621_v30, %s2214_s26 }
 0x1cc   : > { %1756 = vmatmul.mubr.msk.bf16.vlgmr.msra.gmra.mrb[4].mxu1 %vm815_vm2, %v2621_v30 }
 0x1cd   : > { %1761 = vmatprep.mubr.msk.bf16.mxu1 %vm2213_vm0, %v2212_v0 }
 0x1cf   : > { %v797_v33 = vpop.f32.mrb[4].mxu0 }
 0x1d0   : > { %v798_v34 = vadd.f32 %v1672_v32, %v797_v33  ;;  %v1751_v35 = vpop.f32.mrb[5].mxu0 }
 0x1d1   : > { %v800_v36 = vpop.f32.mrb[6].mxu0 }
 0x1d2   : > { %v2634_v37 = vpack.c.bf16 %v798_v34, %v798_v34  ;;  %v1752_v38 = vpop.f32.mrb[7].mxu0 }
 0x1d4   : > { %986 = vrot.lane.b32.xlu0 %v2634_v37, %s2214_s26  ;;  %v877_v39 = vsel %vm875_vm3, %v2634_v37, 0 }
 0x1d5   : > { %1760 = vmatpush3.bf16.msra.mxu1 %v877_v39 }
 0x1d6   : > { %1771 = vmatprep.subr.bf16.mxu1 %v2212_v0 }
 0x1d8   : > { %1133 = vrot.lane.b32.xlu0 %v2618_v28, %s2215_s2 }
 0x236   : > { %v928_v40 = vpop.permute.xlu0 %927 }
 0x237   : > { %v933_v41 = vsel %vm815_vm2, %v928_v40, 0 }
 0x238   : > { %1766 = vmatpush3.bf16.xpose.msra.mxu0 %v933_v41 }
 0x239   : > { %1777 = vmatprep.subr.bf16.mxu0 %v2212_v0 }
 0x23a   : > { %v925_v42 = vpop.permute.xlu0 %924 }
 0x23f   : > { %1768 = vmatmul.mubr.msk.bf16.vlgmr.msra.gmra.mrb[8].mxu0 %vm815_vm2, %v925_v42 }
 0x240   : > { %1779 = vmatprep.mubr.msk.bf16.mxu0 %vm2213_vm0, %v2212_v0  ;;  %1778 = vmatpush3.bf16.msra.mxu0 %v1043_v13 }
 0x241   : > { %1789 = vmatprep.subr.bf16.mxu0 %v2212_v0 }
 0x246   : > { %v987_v62 = vpop.permute.xlu0 %986 }
 0x247   : > { %v992_v63 = vsel %vm875_vm3, %v987_v62, 0 }
 0x24a   : > { %v1134_v14 = vpop.permute.xlu0 %1133 }
 0x24b   : > { %v1139_v34 = vsel %vm815_vm2, %v1134_v14, 0 }
 0x29f   : > { %v856_v46 = vpop.f32.mrb[4].mxu1 }
 0x2a0   : > { %v857_v47 = vadd.f32 %v856_v46, %v2652_v45  ;;  %v1757_v48 = vpop.f32.mrb[5].mxu1 }
 0x2a1   : > { %v859_v49 = vpop.f32.mrb[6].mxu1 }
 0x2a2   : > { %v1758_v50 = vpop.f32.mrb[7].mxu1  ;;  %v862_v51 = vsel %vm815_vm2, %v857_v47, -inf }
 0x2a3   : > { %863 = vmax.xlane.f32.xlu1 %v862_v51 }
 0x312   : > { %v969_v52 = vpop.f32.mrb[8].mxu0 }
 0x313   : > { %v970_v53 = vadd.f32 %v969_v52, %v2652_v45  ;;  %v1769_v54 = vpop.f32.mrb[9].mxu0 }
 0x314   : > { %v972_v55 = vpop.f32.mrb[10].mxu0 }
 0x315   : > { %v1770_v56 = vpop.f32.mrb[11].mxu0  ;;  %v975_v57 = vsel %vm815_vm2, %v970_v53, -inf }
 0x316   : > { %976 = vmax.xlane.f32.xlu1 %v975_v57 }
 0x330   : > { %v864_v58 = vpop.xlane.xlu1 %863 }
 0x331   : > { %v865_v59 = vsub.f32 %v857_v47, %v864_v58 }
 0x333   : > { %v866_v60 = vmul.f32 1.442695, %v865_v59 }
 0x335   : > { %1930 = vpow2.f32 %v866_v60 }
 0x33f   : > { %v1931_v61 = vpop.eup %1930 }
 0x340   : > { %v868_v1 = vsel %vm815_vm2, %v1931_v61, 0.0  ;;  %v871_v2 = vpack.c.bf16 %v1931_v61, %v1931_v61  ;;  %v1243_v61 = vld [vmem:[#allocation11 + $0x8] sm:$0xf] }
 0x341   : > { %869 = vadd.xlane.f32.xlu0 %v868_v1  ;;  %v1248_v62 = vsel %vm875_vm3, %v1243_v61, 0 }
 0x342   : > { %1762 = vmatmul.mubr.msk.bf16.vlgmr.msra.gmra.mrb[8].mxu1 %vm815_vm2, %v871_v2 }
 0x343   : > { %1772 = vmatpush3.bf16.msra.mxu1 %v992_v63  ;;  %1773 = vmatprep.mubr.msk.bf16.mxu1 %vm2213_vm0, %v2212_v0 }
 0x344   : > { %1783 = vmatprep.subr.bf16.mxu1 %v2212_v0 }
 0x357   : > { %1191 = vrot.lane.b32.xlu0 %v2634_v37, %s2215_s2 }
 0x35b   : > { %1291 = vrot.lane.b32.xlu0 %v2621_v30, %s2216_s12 }
 0x3a3   : > { %v977_v3 = vpop.xlane.xlu1 %976 }
 0x3a4   : > { %v978_v4 = vsub.f32 %v970_v53, %v977_v3 }
 0x3a6   : > { %v979_v5 = vmul.f32 1.442695, %v978_v4 }
 0x3a8   : > { %1932 = vpow2.f32 %v979_v5 }
 0x3b2   : > { %v1933_v7 = vpop.eup %1932 }
 0x3b3   : > { %v981_v8 = vsel %vm815_vm2, %v1933_v7, 0.0  ;;  %v984_v10 = vpack.c.bf16 %v1933_v7, %v1933_v7 }
 0x3b4   : > { %982 = vadd.xlane.f32.xlu1 %v981_v8 }
 0x3b5   : > { %1774 = vmatmul.mubr.msk.bf16.vlgmr.msra.gmra.mrb[12].mxu1 %vm815_vm2, %v984_v10 }
 0x3b6   : > { %1784 = vmatpush3.bf16.msra.mxu1 %v1089_v11  ;;  %1785 = vmatprep.mubr.msk.bf16.mxu1 %vm2213_vm0, %v2212_v0 }
 0x3b7   : > { %1795 = vmatprep.subr.bf16.mxu1 %v2212_v0 }
 0x3c5   : > { %1131 = vrot.lane.b32.xlu1 %v2621_v30, %s2215_s2  ;;  %s586_s2 = scalar_lea.vmem [#allocation13], %s2545_s15  ;;  %s2124_s15 = sshll.u32 %s2217_s19, 4  ;;  %s2125_s15 = int_to_ptr.vmem [resolvable:$false] %s2124_s15 }
 0x3c6   : > { %s1505_s6 = sshll.u32 %s586_s2, 4  ;;  %s2740_s6 = int_to_ptr.vmem [resolvable:$true] %s1505_s6 }
 0x3c7   : > { %s2120_s17 = scalar_lea.vmem %s2740_s6, 128  ;;  %p2127_p11 = scmp.lt.s32.totalorder %s2740_s6, %s2125_s15 }
 0x3c8   : > { %p2121_p3 = scmp.ne.s32.totalorder %s2740_s6, %s2120_s17 }
 0x3ca   : > { %p2122_p0 = pnand %p2121_p3, %p2842_p13 }
 0x3cc   : > { %p2123_p10 = pneg %p2122_p0 }
 0x3ce   : > { %v870_v15 = vpop.xlane.xlu0 %869 }
 0x3cf   : > { %1934 = vrcp.f32 %v870_v15 }
 0x3d2   : > { %v1192_v20 = vpop.permute.xlu0 %1191 }
 0x3d3   : > { %v1197_v24 = vsel %vm875_vm3, %v1192_v20, 0 }
 0x3d9   : > { %v1935_v16 = vpop.eup %1934 }
 0x415   : > { %v913_v17 = vpop.f32.mrb[8].mxu1 }
 0x416   : > { %v920_v18 = vmul.f32 %v1935_v16, %v913_v17  ;;  %v1763_v19 = vpop.f32.mrb[9].mxu1 }
 0x417   : > { %v916_v21 = vpop.f32.mrb[10].mxu1 }
 0x418   : > { %v921_v22 = vpack.c.bf16 %v920_v18, %v920_v18  ;;  %v1764_v23 = vpop.f32.mrb[11].mxu1 }
 0x41a   : > { %1786 = vmatmul.mubr.msk.bf16.vlgmr.msra.gmra.mrb[16].mxu1 %vm815_vm2, %v921_v22 }
 0x41b   : > { %1796 = vmatpush3.bf16.msra.mxu1 %v1197_v24  ;;  %1797 = vmatprep.mubr.msk.bf16.mxu1 %vm2213_vm0, %v2212_v0 }
 0x41c   : > { %1807 = vmatprep.subr.bf16.mxu1 %v2212_v0 }
 0x441   : > { %v983_v25 = vpop.xlane.xlu1 %982 }
 0x442   : > { %1936 = vrcp.f32 %v983_v25 }
 0x445   : > { %v1132_v35 = vpop.permute.xlu1 %1131 }
 0x44c   : > { %v1937_v26 = vpop.eup %1936 }
 0x488   : > { %v1028_v27 = vpop.f32.mrb[12].mxu1 }
 0x489   : > { %v1035_v29 = vmul.f32 %v1937_v26, %v1028_v27  ;;  %v1775_v30 = vpop.f32.mrb[13].mxu1 }
 0x48a   : > { %v1031_v31 = vpop.f32.mrb[14].mxu1 }
 0x48b   : > { %v1036_v32 = vpack.c.bf16 %v1035_v29, %v1035_v29  ;;  %v1776_v33 = vpop.f32.mrb[15].mxu1 }
 0x48d   : > { %1780 = vmatmul.mubr.msk.bf16.vlgmr.msra.gmra.mrb[12].mxu0 %vm815_vm2, %v1036_v32 }
 0x48e   : > { %1790 = vmatpush3.bf16.xpose.msra.mxu0 %v1139_v34  ;;  %1791 = vmatprep.mubr.msk.bf16.mxu0 %vm2213_vm0, %v2212_v0 }
 0x48f   : > { %1801 = vmatprep.subr.bf16.mxu0 %v2212_v0 }
 0x495   : > { %1792 = vmatmul.mubr.msk.bf16.vlgmr.msra.gmra.mrb[16].mxu0 %vm815_vm2, %v1132_v35 }
 0x496   : > { %1803 = vmatprep.mubr.msk.bf16.mxu0 %vm2213_vm0, %v2212_v0  ;;  %1802 = vmatpush3.bf16.msra.mxu0 %v1248_v62 }
 0x497   : > { %1813 = vmatprep.subr.bf16.mxu0 %v2212_v0 }
 0x4ed   : > { %v1125_v36 = vpop.f32.mrb[16].mxu1 }
 0x4ee   : > { %v1787_v38 = vpop.f32.mrb[17].mxu1 }
 0x4ef   : > { %v1128_v39 = vpop.f32.mrb[18].mxu1  ;;  %v1689_v38 = vld [vmem:[%s2838_s11] ss:$0 sm:$0xff]  ;;  %s2126_s11 = scalar_lea.vmem %s2125_s15, 256 }
 0x4f0   : > { %v1788_v40 = vpop.f32.mrb[19].mxu1  ;;  %p2128_p9 = scmp.lt.s32.totalorder %s2126_s11, %s2120_s17 }
 0x4f2   : > { %p2129_p6 = por %p2128_p9, %p2127_p11 }
 0x4f4   : > { %p2130_p2 = pnand %p2129_p6, %p2123_p10 }
 0x560   : > { %v1079_v41 = vpop.f32.mrb[12].mxu0 }
 0x561   : > { %v2691_v42 = vadd.f32 %v1125_v36, %v1079_v41  ;;  %v1781_v43 = vpop.f32.mrb[13].mxu0 }
 0x562   : > { %v1082_v44 = vpop.f32.mrb[14].mxu0 }
 0x563   : > { %v1782_v46 = vpop.f32.mrb[15].mxu0 }
 0x568   : > { %v1175_v47 = vpop.f32.mrb[16].mxu0 }
 0x569   : > { %v1176_v48 = vadd.f32 %v1175_v47, %v2652_v45  ;;  %v1793_v49 = vpop.f32.mrb[17].mxu0 }
 0x56a   : > { %v1178_v50 = vpop.f32.mrb[18].mxu0 }
 0x56b   : > { %v1794_v51 = vpop.f32.mrb[19].mxu0  ;;  %v1181_v52 = vsel %vm815_vm2, %v1176_v48, -inf }
 0x56c   : > { %1182 = vmax.xlane.f32.xlu1 %v1181_v52 }
 0x57d   : > { %1293 = vrot.lane.b32.xlu1 %v2618_v28, %s2216_s12  ;;  %v1292_v28 = vpop.permute.xlu0 %1291 }
 0x5f9   : > { %v1183_v53 = vpop.xlane.xlu1 %1182 }
 0x5fa   : > { %v1184_v54 = vsub.f32 %v1176_v48, %v1183_v53 }
 0x5fc   : > { %v1185_v55 = vmul.f32 1.442695, %v1184_v54 }
 0x5fd   : > { %v1294_v57 = vpop.permute.xlu1 %1293 }
 0x5fe   : > { %1938 = vpow2.f32 %v1185_v55  ;;  %v1299_v60 = vsel %vm815_vm2, %v1294_v57, 0  ;;  %v1691_v57 = vld [vmem:[%s2840_s4] ss:$0 sm:$0xff] }
 0x608   : > { %v1939_v56 = vpop.eup %1938 }
 0x609   : > { %v1187_v58 = vsel %vm815_vm2, %v1939_v56, 0.0  ;;  %v1190_v59 = vpack.c.bf16 %v1939_v56, %v1939_v56 }
 0x60a   : > { %1188 = vadd.xlane.f32.xlu0 %v1187_v58 }
 0x60b   : > { %1798 = vmatmul.mubr.msk.bf16.vlgmr.msra.gmra.mrb[20].mxu1 %vm815_vm2, %v1190_v59 }
 0x60c   : > { %1808 = vmatpush3.bf16.xpose.msra.mxu1 %v1299_v60  ;;  %1809 = vmatprep.mubr.msk.bf16.mxu1 %vm2213_vm0, %v2212_v0 }
 0x60d   : > { %1819 = vmatprep.subr.bf16.mxu1 %v2212_v0 }
 0x613   : > { %1810 = vmatmul.mubr.msk.bf16.vlgmr.msra.gmra.mrb[24].mxu1 %vm815_vm2, %v1292_v28 }
 0x614   : > { %1821 = vmatprep.mubr.msk.bf16.mxu1 %vm2213_vm0, %v2212_v0 }
 0x620   : > { %1351 = vrot.lane.b32.xlu0 %v2634_v37, %s2216_s12  ;;  %s2738_s12 = scalar_lea.hbm %s2841_s22, %s1693_s23 }
 0x697   : > { %v1189_v63 = vpop.xlane.xlu0 %1188 }
 0x698   : > { %1940 = vrcp.f32 %v1189_v63 }
 0x69b   : > { %v1352_v5 = vpop.permute.xlu0 %1351 }
 0x69c   : > { %v1357_v10 = vsel %vm875_vm3, %v1352_v5, 0 }
 0x6a2   : > { %v1941_v1 = vpop.eup %1940 }
 0x6de   : > { %v1233_v2 = vpop.f32.mrb[20].mxu1 }
 0x6df   : > { %v1240_v3 = vmul.f32 %v1941_v1, %v1233_v2  ;;  %v1799_v4 = vpop.f32.mrb[21].mxu1 }
 0x6e0   : > { %v1236_v6 = vpop.f32.mrb[22].mxu1 }
 0x6e1   : > { %v1241_v7 = vpack.c.bf16 %v1240_v3, %v1240_v3  ;;  %v1800_v8 = vpop.f32.mrb[23].mxu1 }
 0x6e3   : > { %1804 = vmatmul.mubr.msk.bf16.vlgmr.msra.gmra.mrb[20].mxu0 %vm815_vm2, %v1241_v7 }
 0x6e4   : > { %1814 = vmatpush3.bf16.msra.mxu0 %v1357_v10  ;;  %1815 = vmatprep.mubr.msk.bf16.mxu0 %vm2213_vm0, %v2212_v0  ;;  %v1403_v0 = vld [vmem:[#allocation11 + $0xc] sm:$0xf] }
 0x6e6   : > { %v1335_v37 = vpop.f32.mrb[24].mxu1 }
 0x6e7   : > { %v1336_v11 = vadd.f32 %v1335_v37, %v2652_v45  ;;  %v1811_v12 = vpop.f32.mrb[25].mxu1  ;;  %v1408_v45 = vsel %vm875_vm3, %v1403_v0, 0 }
 0x6e8   : > { %v1338_v13 = vpop.f32.mrb[26].mxu1  ;;  %1820 = vmatpush3.bf16.msra.mxu1 %v1408_v45 }
 0x6e9   : > { %v1812_v14 = vpop.f32.mrb[27].mxu1  ;;  %v1341_v15 = vsel %vm815_vm2, %v1336_v11, -inf }
 0x6ea   : > { %1342 = vmax.xlane.f32.xlu1 %v1341_v15 }
 0x777   : > { %v1343_v16 = vpop.xlane.xlu1 %1342 }
 0x778   : > { %v1344_v17 = vsub.f32 %v1336_v11, %v1343_v16 }
 0x77a   : > { %v1345_v18 = vmul.f32 1.442695, %v1344_v17 }
 0x77c   : > { %1942 = vpow2.f32 %v1345_v18 }
 0x786   : > { %v1943_v19 = vpop.eup %1942 }
 0x787   : > { %v1347_v20 = vsel %vm815_vm2, %v1943_v19, 0.0  ;;  %v1350_v21 = vpack.c.bf16 %v1943_v19, %v1943_v19 }
 0x788   : > { %1348 = vadd.xlane.f32.xlu1 %v1347_v20 }
 0x789   : > { %1816 = vmatmul.mubr.msk.bf16.vlgmr.msra.gmra.mrb[24].mxu0 %vm815_vm2, %v1350_v21 }
 0x7b6   : > { %v1284_v22 = vpop.f32.mrb[20].mxu0 }
 0x7b7   : > { %v1290_v23 = vadd.f32 %v1284_v22, %v2691_v42  ;;  %v1805_v24 = vpop.f32.mrb[21].mxu0 }
 0x7b8   : > { %v1287_v25 = vpop.f32.mrb[22].mxu0 }
 0x7b9   : > { %v1806_v26 = vpop.f32.mrb[23].mxu0 }
 0x815   : > { %v1349_v27 = vpop.xlane.xlu1 %1348 }
 0x816   : > { %1944 = vrcp.f32 %v1349_v27 }
 0x820   : > { %v1945_v29 = vpop.eup %1944 }
 0x85c   : > { %v1393_v30 = vpop.f32.mrb[24].mxu0 }
 0x85d   : > { %v1400_v31 = vmul.f32 %v1945_v29, %v1393_v30  ;;  %v1817_v32 = vpop.f32.mrb[25].mxu0 }
 0x85e   : > { %v1396_v33 = vpop.f32.mrb[26].mxu0 }
 0x85f   : > { %v1401_v34 = vpack.c.bf16 %v1400_v31, %v1400_v31  ;;  %v1818_v35 = vpop.f32.mrb[27].mxu0 }
 0x861   : > { %1822 = vmatmul.mubr.msk.bf16.vlgmr.msra.gmra.mrb[28].mxu1 %vm815_vm2, %v1401_v34 }
 0x934   : > { %v1444_v36 = vpop.f32.mrb[28].mxu1 }
 0x935   : > { %v1450_v39 = vadd.f32 %v1444_v36, %v1290_v23  ;;  %v1823_v40 = vpop.f32.mrb[29].mxu1 }
 0x936   : > { %v1447_v41 = vpop.f32.mrb[30].mxu1 }
 0x937   : > { %v1458_v42 = vadd.f32 %v1689_v38, %v1450_v39  ;;  %v1824_v43 = vpop.f32.mrb[31].mxu1 }
 0x939   : > { %v1459_v44 = vadd.f32 %v1458_v42, %v2591_v9  ;;  %v1690_v9 = vld [vmem:[%s2839_s21] ss:$0 sm:$0xff] }
 0x93b   : > { %v1460_v46 = vsel %vm616_vm1, %v1459_v44, 0.0 }
 0x93c   : > { %1461 = vadd.xlane.f32.xlu1 %v1460_v46 }
 0x9c9   : > { %v1462_v47 = vpop.xlane.xlu1 %1461 }
 0x9ca   : > { %v1464_v48 = vmul.f32 0.03125, %v1462_v47 }
 0x9cc   : > { %v1465_v49 = vsub.f32 %v1459_v44, %v1464_v48 }
 0x9ce   : > { %v1466_v50 = vmul.f32 %v1465_v49, %v1465_v49 }
 0x9d0   : > { %v1467_v51 = vsel %vm616_vm1, %v1466_v50, 0.0 }
 0x9d1   : > { %1468 = vadd.xlane.f32.xlu0 %v1467_v51 }
 0xa5e   : > { %v1469_v52 = vpop.xlane.xlu0 %1468 }
 0xa5f   : > { %v1470_v53 = vmul.f32 0.03125, %v1469_v52 }
 0xa61   : > { %v1471_v54 = vadd.f32 1e-05, %v1470_v53 }
 0xa63   : > { %1946 = vrsqrt.f32 %v1471_v54 }
 0xa6d   : > { %v1947_v55 = vpop.eup %1946 }
 0xa6e   : > { %v1473_v56 = vmul.f32 %v1947_v55, %v1465_v49 }
 0xa70   : > { %v1481_v58 = vmul.f32 %v1690_v9, %v1473_v56 }
 0xa72   : > { %v1489_v59 = vadd.f32 %v1691_v57, %v1481_v58 }
 0xa74   : > { %1490 = vst.msk [vmem:[%s586_s2] sm:$0xff] %vm616_vm1, %v1489_v59 }
 0xa75   : > { %2133 = shalt.err (!%p2130_p2)
}
 0xa76   : > { %s2134_s25 = scalar_lea.hbm %s2738_s12, 128  ;;  %s2138_s21 = scalar_lea.hbm %s2841_s22, 256 }
 0xa77   : > { %p2135_p8 = scmp.ne.s32.totalorder %s2738_s12, %s2134_s25  ;;  %p2139_p7 = scmp.lt.u32.totalorder %s2738_s12, %s2841_s22 }
 0xa78   : > { %p2140_p4 = scmp.lt.u32.totalorder %s2138_s21, %s2134_s25  ;;  %p2142_p3 = scmp.lt.u32.totalorder %s2134_s25, %s2738_s12 }
 0xa79   : > { %p2136_p12 = pnand %p2135_p8, %p2842_p13 }
 0xa7a   : > { %p2141_p1 = por %p2140_p4, %p2139_p7 }
 0xa7b   : > { %p2137_p5 = pneg %p2136_p12 }
 0xa7c   : > { %p2143_p0 = por %p2142_p3, %p2141_p1 }
 0xa7e   : > { %p2144_p10 = pnand %p2143_p0, %p2137_p5 }
 0xa80   : > { %2147 = shalt.err (!%p2144_p10)
}
 0xa81   : > { %1845 = dma.vmem_to_hbm [thread:$0]  (%p2842_p13), %s2740_s6, 128, %s2738_s12, %s1492_s28  }
 0xa82 PF: > { %s1517_s4 = sand.u32 1, %s2190_s29   ;;  %p2843_p11 = scmp.ne.s32.totalorder %s2828_s24, 0 }
 0xa83   : > { %p2844_p9 = scmp.ge.s32.totalorder %s2202_s16, 2  ;;  %s1518_s23 = scalar_lea.sflag [#allocation4], %s1517_s4 }
 0xa85   : > { %p1868_p6 = pnand %p2844_p9, %p2843_p11 }
 0xa87   : > { %2185 = dma.done.wait (!%p1868_p6), %s1518_s23, 128  }
 0xa88   : > { %2187 = vsyncadd (!%p1868_p6), %s1518_s23, 4294967168  ;;  %s2845_s16 = sld [smem:[#allocation21_spill]]  ;;  %s2846_s2 = sld [smem:[#allocation20_spill]] }
 0xa89   : > { %s2847_s15 = sld [smem:[#allocation22_spill]]  ;;  %s2848_s29 = smov %s2194_s30 }
 0xa8e   : > { %p32_p2 = scmp.ge.s32.totalorder %s2845_s16, 4   ;;  %s2849_s30 = smov %s2846_s2 }
 0xa90   :  { %34 = sbr.rel (!%p32_p2) target bundleno = 18 (0x12), region = 156 }
 0xa97   :  { %1523 = vsyncpa [#allocation3], 1 }
 0xa98   :  { %1525 = vsyncpa [#allocation3 + $0x1], 1 }
 0xa99   :  { %1526 = vsyncpa [#allocation6], 1 }
 0xa9a   :  { %1528 = vsyncpa [#allocation6 + $0x1], 1 }
 0xa9b   :  { %1529 = vsyncpa [#allocation9], 1 }
 0xa9c   :  { %1530 = vsyncpa [#allocation12], 1 }
 0xa9d   :  { %1531 = vsyncpa [#allocation4], 1 }
 0xa9e   :  { %1533 = vsyncpa [#allocation4 + $0x1], 1 }

</bundles_post_ra>
